<compile_context>
chip_gen: v5e
topology: v5e:2x2
jax: 0.10.0
libtpu: 0.0.40
codegen_flags: <defaults>
</compile_context>

<pallas_src>
import jax
import jax.numpy as jnp
from jax.experimental import pallas as pl
from jax.experimental.pallas import tpu as pltpu


def make_lstm_kernel(num_layers, hidden, seq_len, batch_pad, in_feat):
    H = hidden
    T = seq_len
    Bp = batch_pad
    L = num_layers

    def cell(gates, c_prev):
        # gate lane layout (i, f, o, g): one sigmoid (3H lanes) + one tanh (H).
        ifo = jax.nn.sigmoid(gates[:, :3 * H])
        g = jnp.tanh(gates[:, 3 * H:])
        c_new = ifo[:, H:2 * H] * c_prev + ifo[:, :H] * g
        h_new = ifo[:, 2 * H:] * jnp.tanh(c_new)
        return h_new, c_new

    def kernel(*refs):
        # inputs : x2d (T*Bp, F) f32,
        #          w_ih0 (F, 4H) f32,
        #          w_hh0 (H, 4H) bf16,
        #          [w_cat (L-1, 2H, 4H) bf16]      (only if L > 1)
        #          b_all (L, 1, 4H) f32  (b_ih + b_hh, gate-repacked),
        #          wb_out (H+1, P) f32   (linear weight with bias as last row)
        # outputs: out (Bp, P) f32
        if L > 1:
            (x_ref, w_ih0_ref, w_hh0_ref, w_cat_ref,
             b_ref, wb_out_ref, out_ref) = refs
        else:
            (x_ref, w_ih0_ref, w_hh0_ref,
             b_ref, wb_out_ref, out_ref) = refs
            w_cat_ref = None

        # ---- layer 0: hoisted input projection over all T timesteps ----
        b0 = b_ref[0]                                           # (1, 4H)
        if in_feat == 1:
            # rank-1 "matmul": VPU broadcast-multiply, no MXU push.
            gx0 = x_ref[...] * w_ih0_ref[...] + b0              # (T*Bp, 4H)
        else:
            gx0 = jnp.dot(x_ref[...], w_ih0_ref[...],
                          preferred_element_type=jnp.float32) + b0

        w_hh0 = w_hh0_ref[...]                                  # (H, 4H) bf16
        w_cat = ([w_cat_ref[l] for l in range(L - 1)]
                 if L > 1 else [])                              # (2H, 4H) bf16 each
        b_up = [b_ref[l] for l in range(1, L)]                  # (1, 4H) f32 each

        # (h, c) carries for every layer live purely in vregs.
        h = [jnp.zeros((Bp, H), jnp.float32) for _ in range(L)]
        c = [jnp.zeros((Bp, H), jnp.float32) for _ in range(L)]

        # ---- fully-unrolled recurrence; only true per-step deps remain, so
        # layers can wavefront across timesteps.
        for t in range(T):
            # layer 0: hoisted gx0 slice (8-aligned) + small recurrent matmul
            gates0 = gx0[t * Bp:(t + 1) * Bp, :] + jnp.dot(
                h[0].astype(w_hh0.dtype), w_hh0,
                preferred_element_type=jnp.float32)             # (Bp, 4H) f32
            h[0], c[0] = cell(gates0, c[0])

            # layers >= 1: fused input+recurrent projection, K = 2H
            for l in range(1, L):
                hin = jnp.concatenate([h[l - 1], h[l]],
                                      axis=1).astype(w_cat[l - 1].dtype)
                gates = jnp.dot(hin, w_cat[l - 1],
                                preferred_element_type=jnp.float32) + b_up[l - 1]
                h[l], c[l] = cell(gates, c[l])

        # final-layer, final-timestep hidden state -> linear head
        out = jnp.dot(h[L - 1], wb_out_ref[:H, :],
                      preferred_element_type=jnp.float32) + wb_out_ref[H:H + 1, :]
        out_ref[...] = out.astype(out_ref.dtype)

    return kernel


def _reorder_gates_ifgo_to_ifog(w, H):
    """PyTorch packs gate blocks as (i, f, g, o); the kernel wants (i, f, o, g)."""
    i, f, g, o = (w[..., :H], w[..., H:2 * H], w[..., 2 * H:3 * H], w[..., 3 * H:])
    return jnp.concatenate([i, f, o, g], axis=-1)


def lstm_forward(x, params, *, hidden, num_layers, pred_len):
    """x: (B, T, F) batch-first (PyTorch convention). Returns (B, pred_len, F)."""
    B, T, F = x.shape
    # The module's final reshape (B, pred_len) -> (B, pred_len, F) requires F == 1.
    assert F == 1, "Lstm's final reshape is only valid for input_feat == 1"
    H = hidden
    L = num_layers

    # Pad batch to f32 sublane granularity so every per-step slice is aligned.
    Bp = ((B + 7) // 8) * 8
    Bp = max(Bp, 8)

    # Time-major, batch-padded, flattened to (T*Bp, F) so layer 0's input
    # projection is one broadcast-multiply over every timestep.
    x_tm = jnp.transpose(x, (1, 0, 2)).astype(jnp.float32)        # (T, B, F)
    x_tm = jnp.pad(x_tm, ((0, 0), (0, Bp - B), (0, 0)))           # (T, Bp, F)
    x2d = x_tm.reshape(T * Bp, F)

    # ---- host-side weight packing ----
    w_ih0_raw, w_hh0_raw, b0_raw = params["layers"][0]
    w_ih0 = _reorder_gates_ifgo_to_ifog(w_ih0_raw, H)                          # (F, 4H) f32
    w_hh0 = _reorder_gates_ifgo_to_ifog(w_hh0_raw, H).astype(jnp.bfloat16)     # (H, 4H) bf16

    b_all = jnp.stack([_reorder_gates_ifgo_to_ifog(params["layers"][l][2], H)
                       for l in range(L)], axis=0)                             # (L, 1, 4H) f32

    w_cat = None
    if L > 1:
        mats = []
        for l in range(1, L):
            w_ih, w_hh, _ = params["layers"][l]
            mats.append(jnp.concatenate(
                [_reorder_gates_ifgo_to_ifog(w_ih, H),
                 _reorder_gates_ifgo_to_ifog(w_hh, H)], axis=0))               # (2H, 4H)
        w_cat = jnp.stack(mats, axis=0).astype(jnp.bfloat16)                   # (L-1, 2H, 4H)

    wb_out = jnp.concatenate([params["w_out"], params["b_out"]], axis=0)       # (H+1, P) f32

    inputs = [x2d, w_ih0, w_hh0]
    if L > 1:
        inputs.append(w_cat)
    inputs += [b_all, wb_out]

    kernel = make_lstm_kernel(L, H, T, Bp, F)
    vmem = pl.BlockSpec(memory_space=pltpu.MemorySpace.VMEM)

    # Single grid point: the whole problem is resident in VMEM.
    out = pl.pallas_call(
        kernel,
        out_shape=jax.ShapeDtypeStruct((Bp, pred_len), jnp.float32),
        in_specs=[vmem] * len(inputs),
        out_specs=vmem,
    )(*inputs)

    # Drop batch padding; PyTorch reshape (B, pred_len) -> (B, pred_len, F).
    return out[:B].reshape(B, pred_len, F)


def init_params(key, input_feat, hidden, num_layers, pred_len):
    """Deterministic init mimicking PyTorch's U(-1/sqrt(H), 1/sqrt(H)).

    Matrices are stored already transposed ((in, 4H), (H, 4H), (H, P)) with
    PyTorch gate order (i, f, g, o); the wrapper repacks gates to (i, f, o, g).
    """
    k = 1.0 / float(jnp.sqrt(jnp.float32(hidden)))
    keys = jax.random.split(key, num_layers * 4 + 2)
    idx = 0
    layers = []
    for l in range(num_layers):
        in_dim = input_feat if l == 0 else hidden
        w_ih = jax.random.uniform(keys[idx], (in_dim, 4 * hidden),
                                  jnp.float32, -k, k); idx += 1
        w_hh = jax.random.uniform(keys[idx], (hidden, 4 * hidden),
                                  jnp.float32, -k, k); idx += 1
        b_ih = jax.random.uniform(keys[idx], (1, 4 * hidden),
                                  jnp.float32, -k, k); idx += 1
        b_hh = jax.random.uniform(keys[idx], (1, 4 * hidden),
                                  jnp.float32, -k, k); idx += 1
        layers.append((w_ih, w_hh, b_ih + b_hh))
    w_out = jax.random.uniform(keys[idx], (hidden, pred_len),
                               jnp.float32, -k, k); idx += 1
    b_out = jax.random.uniform(keys[idx], (1, pred_len),
                               jnp.float32, -k, k)
    return {"layers": layers, "w_out": w_out, "b_out": b_out}


if __name__ == "__main__":
    # module hyperparameters (input_feat must be 1 for the final reshape)
    input_feat = 1
    pred_len = 8
    hidden_units = 32
    num_layers = 2

    batch = 2
    seq_len = 8

    root = jax.random.PRNGKey(0)
    k_x, k_p = jax.random.split(root)
    x = jax.random.normal(k_x, (batch, seq_len, input_feat), jnp.float32)
    params = init_params(k_p, input_feat, hidden_units, num_layers, pred_len)

    out = lstm_forward(x, params, hidden=hidden_units,
                       num_layers=num_layers, pred_len=pred_len)
    out = jax.block_until_ready(out)

    assert out.shape == (batch, pred_len, input_feat), out.shape
    assert bool(jnp.all(jnp.isfinite(out)))
    print("KERNEL_OK")
</pallas_src>

<mosaic_0001>
module attributes {stable_mosaic.version = 11 : i64} {
  func.func @kernel(%arg0: memref<64x1xf32, #tpu.memory_space<vmem>>, %arg1: memref<1x128xf32, #tpu.memory_space<vmem>>, %arg2: memref<32x128xbf16, #tpu.memory_space<vmem>>, %arg3: memref<1x64x128xbf16, #tpu.memory_space<vmem>>, %arg4: memref<2x1x128xf32, #tpu.memory_space<vmem>>, %arg5: memref<33x8xf32, #tpu.memory_space<vmem>>, %arg6: memref<8x8xf32, #tpu.memory_space<vmem>>) attributes {dimension_semantics = [], scalar_prefetch = 0 : i64, scratch_operands = 0 : i64, tpu.core_type = #tpu.core_type<tc>} {
    %c0 = arith.constant 0 : index
    %c0_0 = arith.constant 0 : index
    %c0_1 = arith.constant 0 : index
    %0 = vector.load %arg4[%c0, %c0_0, %c0_1] : memref<2x1x128xf32, #tpu.memory_space<vmem>>, vector<1x1x128xf32>
    %1 = vector.shape_cast %0 : vector<1x1x128xf32> to vector<1x128xf32>
    %c0_2 = arith.constant 0 : index
    %c0_3 = arith.constant 0 : index
    %2 = vector.load %arg0[%c0_2, %c0_3] : memref<64x1xf32, #tpu.memory_space<vmem>>, vector<64x1xf32>
    %c0_4 = arith.constant 0 : index
    %c0_5 = arith.constant 0 : index
    %3 = vector.load %arg1[%c0_4, %c0_5] : memref<1x128xf32, #tpu.memory_space<vmem>>, vector<1x128xf32>
    %4 = vector.broadcast %2 : vector<64x1xf32> to vector<64x128xf32>
    %5 = vector.broadcast %3 : vector<1x128xf32> to vector<64x128xf32>
    %6 = arith.mulf %4, %5 : vector<64x128xf32>
    %7 = vector.broadcast %1 : vector<1x128xf32> to vector<64x128xf32>
    %8 = arith.addf %6, %7 : vector<64x128xf32>
    %c0_6 = arith.constant 0 : index
    %c0_7 = arith.constant 0 : index
    %9 = vector.load %arg2[%c0_6, %c0_7] : memref<32x128xbf16, #tpu.memory_space<vmem>>, vector<32x128xbf16>
    %c0_8 = arith.constant 0 : index
    %c0_9 = arith.constant 0 : index
    %c0_10 = arith.constant 0 : index
    %10 = vector.load %arg3[%c0_8, %c0_9, %c0_10] : memref<1x64x128xbf16, #tpu.memory_space<vmem>>, vector<1x64x128xbf16>
    %11 = vector.shape_cast %10 : vector<1x64x128xbf16> to vector<64x128xbf16>
    %c1 = arith.constant 1 : index
    %c0_11 = arith.constant 0 : index
    %c0_12 = arith.constant 0 : index
    %12 = vector.load %arg4[%c1, %c0_11, %c0_12] : memref<2x1x128xf32, #tpu.memory_space<vmem>>, vector<1x1x128xf32>
    %13 = vector.shape_cast %12 : vector<1x1x128xf32> to vector<1x128xf32>
    %cst = arith.constant 0.000000e+00 : f32
    %14 = vector.broadcast %cst : f32 to vector<8x32xf32>
    %cst_13 = arith.constant 0.000000e+00 : f32
    %15 = vector.broadcast %cst_13 : f32 to vector<8x32xf32>
    %cst_14 = arith.constant 0.000000e+00 : f32
    %16 = vector.broadcast %cst_14 : f32 to vector<8x32xf32>
    %cst_15 = arith.constant 0.000000e+00 : f32
    %17 = vector.broadcast %cst_15 : f32 to vector<8x32xf32>
    %18 = vector.extract_strided_slice %8 {offsets = [0, 0], sizes = [8, 128], strides = [1, 1]} : vector<64x128xf32> to vector<8x128xf32>
    %19 = arith.truncf %14 : vector<8x32xf32> to vector<8x32xbf16>
    %cst_16 = arith.constant dense<0.000000e+00> : vector<8x128xf32>
    %20 = tpu.matmul %19, %9, %cst_16 {dimension_numbers = #tpu.dot_dimension_numbers<[1], [0], [0], [1], [0, 0, 1, 1], [], []>} : vector<8x32xbf16>, vector<32x128xbf16>, vector<8x128xf32> -> vector<8x128xf32>
    %21 = arith.addf %18, %20 : vector<8x128xf32>
    %22 = vector.extract_strided_slice %21 {offsets = [0, 0], sizes = [8, 96], strides = [1, 1]} : vector<8x128xf32> to vector<8x96xf32>
    %23 = arith.negf %22 : vector<8x96xf32>
    %24 = math.exp %23 : vector<8x96xf32>
    %cst_17 = arith.constant 1.000000e+00 : f32
    %25 = vector.broadcast %cst_17 : f32 to vector<8x96xf32>
    %26 = arith.addf %25, %24 : vector<8x96xf32>
    %27 = arith.divf %25, %26 : vector<8x96xf32>
    %28 = vector.extract_strided_slice %21 {offsets = [0, 96], sizes = [8, 32], strides = [1, 1]} : vector<8x128xf32> to vector<8x32xf32>
    %29 = math.tanh %28 : vector<8x32xf32>
    %30 = vector.extract_strided_slice %27 {offsets = [0, 32], sizes = [8, 32], strides = [1, 1]} : vector<8x96xf32> to vector<8x32xf32>
    %31 = arith.mulf %30, %16 : vector<8x32xf32>
    %32 = vector.extract_strided_slice %27 {offsets = [0, 0], sizes = [8, 32], strides = [1, 1]} : vector<8x96xf32> to vector<8x32xf32>
    %33 = arith.mulf %32, %29 : vector<8x32xf32>
    %34 = arith.addf %31, %33 : vector<8x32xf32>
    %35 = vector.extract_strided_slice %27 {offsets = [0, 64], sizes = [8, 32], strides = [1, 1]} : vector<8x96xf32> to vector<8x32xf32>
    %36 = math.tanh %34 : vector<8x32xf32>
    %37 = arith.mulf %35, %36 : vector<8x32xf32>
    %38 = tpu.concatenate %37, %15 in 1 : vector<8x32xf32>, vector<8x32xf32> -> vector<8x64xf32>
    %39 = arith.truncf %38 : vector<8x64xf32> to vector<8x64xbf16>
    %cst_18 = arith.constant dense<0.000000e+00> : vector<8x128xf32>
    %40 = tpu.matmul %39, %11, %cst_18 {dimension_numbers = #tpu.dot_dimension_numbers<[1], [0], [0], [1], [0, 0, 1, 1], [], []>} : vector<8x64xbf16>, vector<64x128xbf16>, vector<8x128xf32> -> vector<8x128xf32>
    %41 = vector.broadcast %13 : vector<1x128xf32> to vector<8x128xf32>
    %42 = arith.addf %40, %41 : vector<8x128xf32>
    %43 = vector.extract_strided_slice %42 {offsets = [0, 0], sizes = [8, 96], strides = [1, 1]} : vector<8x128xf32> to vector<8x96xf32>
    %44 = arith.negf %43 : vector<8x96xf32>
    %45 = math.exp %44 : vector<8x96xf32>
    %cst_19 = arith.constant 1.000000e+00 : f32
    %46 = vector.broadcast %cst_19 : f32 to vector<8x96xf32>
    %47 = arith.addf %46, %45 : vector<8x96xf32>
    %48 = arith.divf %46, %47 : vector<8x96xf32>
    %49 = vector.extract_strided_slice %42 {offsets = [0, 96], sizes = [8, 32], strides = [1, 1]} : vector<8x128xf32> to vector<8x32xf32>
    %50 = math.tanh %49 : vector<8x32xf32>
    %51 = vector.extract_strided_slice %48 {offsets = [0, 32], sizes = [8, 32], strides = [1, 1]} : vector<8x96xf32> to vector<8x32xf32>
    %52 = arith.mulf %51, %17 : vector<8x32xf32>
    %53 = vector.extract_strided_slice %48 {offsets = [0, 0], sizes = [8, 32], strides = [1, 1]} : vector<8x96xf32> to vector<8x32xf32>
    %54 = arith.mulf %53, %50 : vector<8x32xf32>
    %55 = arith.addf %52, %54 : vector<8x32xf32>
    %56 = vector.extract_strided_slice %48 {offsets = [0, 64], sizes = [8, 32], strides = [1, 1]} : vector<8x96xf32> to vector<8x32xf32>
    %57 = math.tanh %55 : vector<8x32xf32>
    %58 = arith.mulf %56, %57 : vector<8x32xf32>
    %59 = vector.extract_strided_slice %8 {offsets = [8, 0], sizes = [8, 128], strides = [1, 1]} : vector<64x128xf32> to vector<8x128xf32>
    %60 = arith.truncf %37 : vector<8x32xf32> to vector<8x32xbf16>
    %cst_20 = arith.constant dense<0.000000e+00> : vector<8x128xf32>
    %61 = tpu.matmul %60, %9, %cst_20 {dimension_numbers = #tpu.dot_dimension_numbers<[1], [0], [0], [1], [0, 0, 1, 1], [], []>} : vector<8x32xbf16>, vector<32x128xbf16>, vector<8x128xf32> -> vector<8x128xf32>
    %62 = arith.addf %59, %61 : vector<8x128xf32>
    %63 = vector.extract_strided_slice %62 {offsets = [0, 0], sizes = [8, 96], strides = [1, 1]} : vector<8x128xf32> to vector<8x96xf32>
    %64 = arith.negf %63 : vector<8x96xf32>
    %65 = math.exp %64 : vector<8x96xf32>
    %cst_21 = arith.constant 1.000000e+00 : f32
    %66 = vector.broadcast %cst_21 : f32 to vector<8x96xf32>
    %67 = arith.addf %66, %65 : vector<8x96xf32>
    %68 = arith.divf %66, %67 : vector<8x96xf32>
    %69 = vector.extract_strided_slice %62 {offsets = [0, 96], sizes = [8, 32], strides = [1, 1]} : vector<8x128xf32> to vector<8x32xf32>
    %70 = math.tanh %69 : vector<8x32xf32>
    %71 = vector.extract_strided_slice %68 {offsets = [0, 32], sizes = [8, 32], strides = [1, 1]} : vector<8x96xf32> to vector<8x32xf32>
    %72 = arith.mulf %71, %34 : vector<8x32xf32>
    %73 = vector.extract_strided_slice %68 {offsets = [0, 0], sizes = [8, 32], strides = [1, 1]} : vector<8x96xf32> to vector<8x32xf32>
    %74 = arith.mulf %73, %70 : vector<8x32xf32>
    %75 = arith.addf %72, %74 : vector<8x32xf32>
    %76 = vector.extract_strided_slice %68 {offsets = [0, 64], sizes = [8, 32], strides = [1, 1]} : vector<8x96xf32> to vector<8x32xf32>
    %77 = math.tanh %75 : vector<8x32xf32>
    %78 = arith.mulf %76, %77 : vector<8x32xf32>
    %79 = tpu.concatenate %78, %58 in 1 : vector<8x32xf32>, vector<8x32xf32> -> vector<8x64xf32>
    %80 = arith.truncf %79 : vector<8x64xf32> to vector<8x64xbf16>
    %cst_22 = arith.constant dense<0.000000e+00> : vector<8x128xf32>
    %81 = tpu.matmul %80, %11, %cst_22 {dimension_numbers = #tpu.dot_dimension_numbers<[1], [0], [0], [1], [0, 0, 1, 1], [], []>} : vector<8x64xbf16>, vector<64x128xbf16>, vector<8x128xf32> -> vector<8x128xf32>
    %82 = vector.broadcast %13 : vector<1x128xf32> to vector<8x128xf32>
    %83 = arith.addf %81, %82 : vector<8x128xf32>
    %84 = vector.extract_strided_slice %83 {offsets = [0, 0], sizes = [8, 96], strides = [1, 1]} : vector<8x128xf32> to vector<8x96xf32>
    %85 = arith.negf %84 : vector<8x96xf32>
    %86 = math.exp %85 : vector<8x96xf32>
    %cst_23 = arith.constant 1.000000e+00 : f32
    %87 = vector.broadcast %cst_23 : f32 to vector<8x96xf32>
    %88 = arith.addf %87, %86 : vector<8x96xf32>
    %89 = arith.divf %87, %88 : vector<8x96xf32>
    %90 = vector.extract_strided_slice %83 {offsets = [0, 96], sizes = [8, 32], strides = [1, 1]} : vector<8x128xf32> to vector<8x32xf32>
    %91 = math.tanh %90 : vector<8x32xf32>
    %92 = vector.extract_strided_slice %89 {offsets = [0, 32], sizes = [8, 32], strides = [1, 1]} : vector<8x96xf32> to vector<8x32xf32>
    %93 = arith.mulf %92, %55 : vector<8x32xf32>
    %94 = vector.extract_strided_slice %89 {offsets = [0, 0], sizes = [8, 32], strides = [1, 1]} : vector<8x96xf32> to vector<8x32xf32>
    %95 = arith.mulf %94, %91 : vector<8x32xf32>
    %96 = arith.addf %93, %95 : vector<8x32xf32>
    %97 = vector.extract_strided_slice %89 {offsets = [0, 64], sizes = [8, 32], strides = [1, 1]} : vector<8x96xf32> to vector<8x32xf32>
    %98 = math.tanh %96 : vector<8x32xf32>
    %99 = arith.mulf %97, %98 : vector<8x32xf32>
    %100 = vector.extract_strided_slice %8 {offsets = [16, 0], sizes = [8, 128], strides = [1, 1]} : vector<64x128xf32> to vector<8x128xf32>
    %101 = arith.truncf %78 : vector<8x32xf32> to vector<8x32xbf16>
    %cst_24 = arith.constant dense<0.000000e+00> : vector<8x128xf32>
    %102 = tpu.matmul %101, %9, %cst_24 {dimension_numbers = #tpu.dot_dimension_numbers<[1], [0], [0], [1], [0, 0, 1, 1], [], []>} : vector<8x32xbf16>, vector<32x128xbf16>, vector<8x128xf32> -> vector<8x128xf32>
    %103 = arith.addf %100, %102 : vector<8x128xf32>
    %104 = vector.extract_strided_slice %103 {offsets = [0, 0], sizes = [8, 96], strides = [1, 1]} : vector<8x128xf32> to vector<8x96xf32>
    %105 = arith.negf %104 : vector<8x96xf32>
    %106 = math.exp %105 : vector<8x96xf32>
    %cst_25 = arith.constant 1.000000e+00 : f32
    %107 = vector.broadcast %cst_25 : f32 to vector<8x96xf32>
    %108 = arith.addf %107, %106 : vector<8x96xf32>
    %109 = arith.divf %107, %108 : vector<8x96xf32>
    %110 = vector.extract_strided_slice %103 {offsets = [0, 96], sizes = [8, 32], strides = [1, 1]} : vector<8x128xf32> to vector<8x32xf32>
    %111 = math.tanh %110 : vector<8x32xf32>
    %112 = vector.extract_strided_slice %109 {offsets = [0, 32], sizes = [8, 32], strides = [1, 1]} : vector<8x96xf32> to vector<8x32xf32>
    %113 = arith.mulf %112, %75 : vector<8x32xf32>
    %114 = vector.extract_strided_slice %109 {offsets = [0, 0], sizes = [8, 32], strides = [1, 1]} : vector<8x96xf32> to vector<8x32xf32>
    %115 = arith.mulf %114, %111 : vector<8x32xf32>
    %116 = arith.addf %113, %115 : vector<8x32xf32>
    %117 = vector.extract_strided_slice %109 {offsets = [0, 64], sizes = [8, 32], strides = [1, 1]} : vector<8x96xf32> to vector<8x32xf32>
    %118 = math.tanh %116 : vector<8x32xf32>
    %119 = arith.mulf %117, %118 : vector<8x32xf32>
    %120 = tpu.concatenate %119, %99 in 1 : vector<8x32xf32>, vector<8x32xf32> -> vector<8x64xf32>
    %121 = arith.truncf %120 : vector<8x64xf32> to vector<8x64xbf16>
    %cst_26 = arith.constant dense<0.000000e+00> : vector<8x128xf32>
    %122 = tpu.matmul %121, %11, %cst_26 {dimension_numbers = #tpu.dot_dimension_numbers<[1], [0], [0], [1], [0, 0, 1, 1], [], []>} : vector<8x64xbf16>, vector<64x128xbf16>, vector<8x128xf32> -> vector<8x128xf32>
    %123 = vector.broadcast %13 : vector<1x128xf32> to vector<8x128xf32>
    %124 = arith.addf %122, %123 : vector<8x128xf32>
    %125 = vector.extract_strided_slice %124 {offsets = [0, 0], sizes = [8, 96], strides = [1, 1]} : vector<8x128xf32> to vector<8x96xf32>
    %126 = arith.negf %125 : vector<8x96xf32>
    %127 = math.exp %126 : vector<8x96xf32>
    %cst_27 = arith.constant 1.000000e+00 : f32
    %128 = vector.broadcast %cst_27 : f32 to vector<8x96xf32>
    %129 = arith.addf %128, %127 : vector<8x96xf32>
    %130 = arith.divf %128, %129 : vector<8x96xf32>
    %131 = vector.extract_strided_slice %124 {offsets = [0, 96], sizes = [8, 32], strides = [1, 1]} : vector<8x128xf32> to vector<8x32xf32>
    %132 = math.tanh %131 : vector<8x32xf32>
    %133 = vector.extract_strided_slice %130 {offsets = [0, 32], sizes = [8, 32], strides = [1, 1]} : vector<8x96xf32> to vector<8x32xf32>
    %134 = arith.mulf %133, %96 : vector<8x32xf32>
    %135 = vector.extract_strided_slice %130 {offsets = [0, 0], sizes = [8, 32], strides = [1, 1]} : vector<8x96xf32> to vector<8x32xf32>
    %136 = arith.mulf %135, %132 : vector<8x32xf32>
    %137 = arith.addf %134, %136 : vector<8x32xf32>
    %138 = vector.extract_strided_slice %130 {offsets = [0, 64], sizes = [8, 32], strides = [1, 1]} : vector<8x96xf32> to vector<8x32xf32>
    %139 = math.tanh %137 : vector<8x32xf32>
    %140 = arith.mulf %138, %139 : vector<8x32xf32>
    %141 = vector.extract_strided_slice %8 {offsets = [24, 0], sizes = [8, 128], strides = [1, 1]} : vector<64x128xf32> to vector<8x128xf32>
    %142 = arith.truncf %119 : vector<8x32xf32> to vector<8x32xbf16>
    %cst_28 = arith.constant dense<0.000000e+00> : vector<8x128xf32>
    %143 = tpu.matmul %142, %9, %cst_28 {dimension_numbers = #tpu.dot_dimension_numbers<[1], [0], [0], [1], [0, 0, 1, 1], [], []>} : vector<8x32xbf16>, vector<32x128xbf16>, vector<8x128xf32> -> vector<8x128xf32>
    %144 = arith.addf %141, %143 : vector<8x128xf32>
    %145 = vector.extract_strided_slice %144 {offsets = [0, 0], sizes = [8, 96], strides = [1, 1]} : vector<8x128xf32> to vector<8x96xf32>
    %146 = arith.negf %145 : vector<8x96xf32>
    %147 = math.exp %146 : vector<8x96xf32>
    %cst_29 = arith.constant 1.000000e+00 : f32
    %148 = vector.broadcast %cst_29 : f32 to vector<8x96xf32>
    %149 = arith.addf %148, %147 : vector<8x96xf32>
    %150 = arith.divf %148, %149 : vector<8x96xf32>
    %151 = vector.extract_strided_slice %144 {offsets = [0, 96], sizes = [8, 32], strides = [1, 1]} : vector<8x128xf32> to vector<8x32xf32>
    %152 = math.tanh %151 : vector<8x32xf32>
    %153 = vector.extract_strided_slice %150 {offsets = [0, 32], sizes = [8, 32], strides = [1, 1]} : vector<8x96xf32> to vector<8x32xf32>
    %154 = arith.mulf %153, %116 : vector<8x32xf32>
    %155 = vector.extract_strided_slice %150 {offsets = [0, 0], sizes = [8, 32], strides = [1, 1]} : vector<8x96xf32> to vector<8x32xf32>
    %156 = arith.mulf %155, %152 : vector<8x32xf32>
    %157 = arith.addf %154, %156 : vector<8x32xf32>
    %158 = vector.extract_strided_slice %150 {offsets = [0, 64], sizes = [8, 32], strides = [1, 1]} : vector<8x96xf32> to vector<8x32xf32>
    %159 = math.tanh %157 : vector<8x32xf32>
    %160 = arith.mulf %158, %159 : vector<8x32xf32>
    %161 = tpu.concatenate %160, %140 in 1 : vector<8x32xf32>, vector<8x32xf32> -> vector<8x64xf32>
    %162 = arith.truncf %161 : vector<8x64xf32> to vector<8x64xbf16>
    %cst_30 = arith.constant dense<0.000000e+00> : vector<8x128xf32>
    %163 = tpu.matmul %162, %11, %cst_30 {dimension_numbers = #tpu.dot_dimension_numbers<[1], [0], [0], [1], [0, 0, 1, 1], [], []>} : vector<8x64xbf16>, vector<64x128xbf16>, vector<8x128xf32> -> vector<8x128xf32>
    %164 = vector.broadcast %13 : vector<1x128xf32> to vector<8x128xf32>
    %165 = arith.addf %163, %164 : vector<8x128xf32>
    %166 = vector.extract_strided_slice %165 {offsets = [0, 0], sizes = [8, 96], strides = [1, 1]} : vector<8x128xf32> to vector<8x96xf32>
    %167 = arith.negf %166 : vector<8x96xf32>
    %168 = math.exp %167 : vector<8x96xf32>
    %cst_31 = arith.constant 1.000000e+00 : f32
    %169 = vector.broadcast %cst_31 : f32 to vector<8x96xf32>
    %170 = arith.addf %169, %168 : vector<8x96xf32>
    %171 = arith.divf %169, %170 : vector<8x96xf32>
    %172 = vector.extract_strided_slice %165 {offsets = [0, 96], sizes = [8, 32], strides = [1, 1]} : vector<8x128xf32> to vector<8x32xf32>
    %173 = math.tanh %172 : vector<8x32xf32>
    %174 = vector.extract_strided_slice %171 {offsets = [0, 32], sizes = [8, 32], strides = [1, 1]} : vector<8x96xf32> to vector<8x32xf32>
    %175 = arith.mulf %174, %137 : vector<8x32xf32>
    %176 = vector.extract_strided_slice %171 {offsets = [0, 0], sizes = [8, 32], strides = [1, 1]} : vector<8x96xf32> to vector<8x32xf32>
    %177 = arith.mulf %176, %173 : vector<8x32xf32>
    %178 = arith.addf %175, %177 : vector<8x32xf32>
    %179 = vector.extract_strided_slice %171 {offsets = [0, 64], sizes = [8, 32], strides = [1, 1]} : vector<8x96xf32> to vector<8x32xf32>
    %180 = math.tanh %178 : vector<8x32xf32>
    %181 = arith.mulf %179, %180 : vector<8x32xf32>
    %182 = vector.extract_strided_slice %8 {offsets = [32, 0], sizes = [8, 128], strides = [1, 1]} : vector<64x128xf32> to vector<8x128xf32>
    %183 = arith.truncf %160 : vector<8x32xf32> to vector<8x32xbf16>
    %cst_32 = arith.constant dense<0.000000e+00> : vector<8x128xf32>
    %184 = tpu.matmul %183, %9, %cst_32 {dimension_numbers = #tpu.dot_dimension_numbers<[1], [0], [0], [1], [0, 0, 1, 1], [], []>} : vector<8x32xbf16>, vector<32x128xbf16>, vector<8x128xf32> -> vector<8x128xf32>
    %185 = arith.addf %182, %184 : vector<8x128xf32>
    %186 = vector.extract_strided_slice %185 {offsets = [0, 0], sizes = [8, 96], strides = [1, 1]} : vector<8x128xf32> to vector<8x96xf32>
    %187 = arith.negf %186 : vector<8x96xf32>
    %188 = math.exp %187 : vector<8x96xf32>
    %cst_33 = arith.constant 1.000000e+00 : f32
    %189 = vector.broadcast %cst_33 : f32 to vector<8x96xf32>
    %190 = arith.addf %189, %188 : vector<8x96xf32>
    %191 = arith.divf %189, %190 : vector<8x96xf32>
    %192 = vector.extract_strided_slice %185 {offsets = [0, 96], sizes = [8, 32], strides = [1, 1]} : vector<8x128xf32> to vector<8x32xf32>
    %193 = math.tanh %192 : vector<8x32xf32>
    %194 = vector.extract_strided_slice %191 {offsets = [0, 32], sizes = [8, 32], strides = [1, 1]} : vector<8x96xf32> to vector<8x32xf32>
    %195 = arith.mulf %194, %157 : vector<8x32xf32>
    %196 = vector.extract_strided_slice %191 {offsets = [0, 0], sizes = [8, 32], strides = [1, 1]} : vector<8x96xf32> to vector<8x32xf32>
    %197 = arith.mulf %196, %193 : vector<8x32xf32>
    %198 = arith.addf %195, %197 : vector<8x32xf32>
    %199 = vector.extract_strided_slice %191 {offsets = [0, 64], sizes = [8, 32], strides = [1, 1]} : vector<8x96xf32> to vector<8x32xf32>
    %200 = math.tanh %198 : vector<8x32xf32>
    %201 = arith.mulf %199, %200 : vector<8x32xf32>
    %202 = tpu.concatenate %201, %181 in 1 : vector<8x32xf32>, vector<8x32xf32> -> vector<8x64xf32>
    %203 = arith.truncf %202 : vector<8x64xf32> to vector<8x64xbf16>
    %cst_34 = arith.constant dense<0.000000e+00> : vector<8x128xf32>
    %204 = tpu.matmul %203, %11, %cst_34 {dimension_numbers = #tpu.dot_dimension_numbers<[1], [0], [0], [1], [0, 0, 1, 1], [], []>} : vector<8x64xbf16>, vector<64x128xbf16>, vector<8x128xf32> -> vector<8x128xf32>
    %205 = vector.broadcast %13 : vector<1x128xf32> to vector<8x128xf32>
    %206 = arith.addf %204, %205 : vector<8x128xf32>
    %207 = vector.extract_strided_slice %206 {offsets = [0, 0], sizes = [8, 96], strides = [1, 1]} : vector<8x128xf32> to vector<8x96xf32>
    %208 = arith.negf %207 : vector<8x96xf32>
    %209 = math.exp %208 : vector<8x96xf32>
    %cst_35 = arith.constant 1.000000e+00 : f32
    %210 = vector.broadcast %cst_35 : f32 to vector<8x96xf32>
    %211 = arith.addf %210, %209 : vector<8x96xf32>
    %212 = arith.divf %210, %211 : vector<8x96xf32>
    %213 = vector.extract_strided_slice %206 {offsets = [0, 96], sizes = [8, 32], strides = [1, 1]} : vector<8x128xf32> to vector<8x32xf32>
    %214 = math.tanh %213 : vector<8x32xf32>
    %215 = vector.extract_strided_slice %212 {offsets = [0, 32], sizes = [8, 32], strides = [1, 1]} : vector<8x96xf32> to vector<8x32xf32>
    %216 = arith.mulf %215, %178 : vector<8x32xf32>
    %217 = vector.extract_strided_slice %212 {offsets = [0, 0], sizes = [8, 32], strides = [1, 1]} : vector<8x96xf32> to vector<8x32xf32>
    %218 = arith.mulf %217, %214 : vector<8x32xf32>
    %219 = arith.addf %216, %218 : vector<8x32xf32>
    %220 = vector.extract_strided_slice %212 {offsets = [0, 64], sizes = [8, 32], strides = [1, 1]} : vector<8x96xf32> to vector<8x32xf32>
    %221 = math.tanh %219 : vector<8x32xf32>
    %222 = arith.mulf %220, %221 : vector<8x32xf32>
    %223 = vector.extract_strided_slice %8 {offsets = [40, 0], sizes = [8, 128], strides = [1, 1]} : vector<64x128xf32> to vector<8x128xf32>
    %224 = arith.truncf %201 : vector<8x32xf32> to vector<8x32xbf16>
    %cst_36 = arith.constant dense<0.000000e+00> : vector<8x128xf32>
    %225 = tpu.matmul %224, %9, %cst_36 {dimension_numbers = #tpu.dot_dimension_numbers<[1], [0], [0], [1], [0, 0, 1, 1], [], []>} : vector<8x32xbf16>, vector<32x128xbf16>, vector<8x128xf32> -> vector<8x128xf32>
    %226 = arith.addf %223, %225 : vector<8x128xf32>
    %227 = vector.extract_strided_slice %226 {offsets = [0, 0], sizes = [8, 96], strides = [1, 1]} : vector<8x128xf32> to vector<8x96xf32>
    %228 = arith.negf %227 : vector<8x96xf32>
    %229 = math.exp %228 : vector<8x96xf32>
    %cst_37 = arith.constant 1.000000e+00 : f32
    %230 = vector.broadcast %cst_37 : f32 to vector<8x96xf32>
    %231 = arith.addf %230, %229 : vector<8x96xf32>
    %232 = arith.divf %230, %231 : vector<8x96xf32>
    %233 = vector.extract_strided_slice %226 {offsets = [0, 96], sizes = [8, 32], strides = [1, 1]} : vector<8x128xf32> to vector<8x32xf32>
    %234 = math.tanh %233 : vector<8x32xf32>
    %235 = vector.extract_strided_slice %232 {offsets = [0, 32], sizes = [8, 32], strides = [1, 1]} : vector<8x96xf32> to vector<8x32xf32>
    %236 = arith.mulf %235, %198 : vector<8x32xf32>
    %237 = vector.extract_strided_slice %232 {offsets = [0, 0], sizes = [8, 32], strides = [1, 1]} : vector<8x96xf32> to vector<8x32xf32>
    %238 = arith.mulf %237, %234 : vector<8x32xf32>
    %239 = arith.addf %236, %238 : vector<8x32xf32>
    %240 = vector.extract_strided_slice %232 {offsets = [0, 64], sizes = [8, 32], strides = [1, 1]} : vector<8x96xf32> to vector<8x32xf32>
    %241 = math.tanh %239 : vector<8x32xf32>
    %242 = arith.mulf %240, %241 : vector<8x32xf32>
    %243 = tpu.concatenate %242, %222 in 1 : vector<8x32xf32>, vector<8x32xf32> -> vector<8x64xf32>
    %244 = arith.truncf %243 : vector<8x64xf32> to vector<8x64xbf16>
    %cst_38 = arith.constant dense<0.000000e+00> : vector<8x128xf32>
    %245 = tpu.matmul %244, %11, %cst_38 {dimension_numbers = #tpu.dot_dimension_numbers<[1], [0], [0], [1], [0, 0, 1, 1], [], []>} : vector<8x64xbf16>, vector<64x128xbf16>, vector<8x128xf32> -> vector<8x128xf32>
    %246 = vector.broadcast %13 : vector<1x128xf32> to vector<8x128xf32>
    %247 = arith.addf %245, %246 : vector<8x128xf32>
    %248 = vector.extract_strided_slice %247 {offsets = [0, 0], sizes = [8, 96], strides = [1, 1]} : vector<8x128xf32> to vector<8x96xf32>
    %249 = arith.negf %248 : vector<8x96xf32>
    %250 = math.exp %249 : vector<8x96xf32>
    %cst_39 = arith.constant 1.000000e+00 : f32
    %251 = vector.broadcast %cst_39 : f32 to vector<8x96xf32>
    %252 = arith.addf %251, %250 : vector<8x96xf32>
    %253 = arith.divf %251, %252 : vector<8x96xf32>
    %254 = vector.extract_strided_slice %247 {offsets = [0, 96], sizes = [8, 32], strides = [1, 1]} : vector<8x128xf32> to vector<8x32xf32>
    %255 = math.tanh %254 : vector<8x32xf32>
    %256 = vector.extract_strided_slice %253 {offsets = [0, 32], sizes = [8, 32], strides = [1, 1]} : vector<8x96xf32> to vector<8x32xf32>
    %257 = arith.mulf %256, %219 : vector<8x32xf32>
    %258 = vector.extract_strided_slice %253 {offsets = [0, 0], sizes = [8, 32], strides = [1, 1]} : vector<8x96xf32> to vector<8x32xf32>
    %259 = arith.mulf %258, %255 : vector<8x32xf32>
    %260 = arith.addf %257, %259 : vector<8x32xf32>
    %261 = vector.extract_strided_slice %253 {offsets = [0, 64], sizes = [8, 32], strides = [1, 1]} : vector<8x96xf32> to vector<8x32xf32>
    %262 = math.tanh %260 : vector<8x32xf32>
    %263 = arith.mulf %261, %262 : vector<8x32xf32>
    %264 = vector.extract_strided_slice %8 {offsets = [48, 0], sizes = [8, 128], strides = [1, 1]} : vector<64x128xf32> to vector<8x128xf32>
    %265 = arith.truncf %242 : vector<8x32xf32> to vector<8x32xbf16>
    %cst_40 = arith.constant dense<0.000000e+00> : vector<8x128xf32>
    %266 = tpu.matmul %265, %9, %cst_40 {dimension_numbers = #tpu.dot_dimension_numbers<[1], [0], [0], [1], [0, 0, 1, 1], [], []>} : vector<8x32xbf16>, vector<32x128xbf16>, vector<8x128xf32> -> vector<8x128xf32>
    %267 = arith.addf %264, %266 : vector<8x128xf32>
    %268 = vector.extract_strided_slice %267 {offsets = [0, 0], sizes = [8, 96], strides = [1, 1]} : vector<8x128xf32> to vector<8x96xf32>
    %269 = arith.negf %268 : vector<8x96xf32>
    %270 = math.exp %269 : vector<8x96xf32>
    %cst_41 = arith.constant 1.000000e+00 : f32
    %271 = vector.broadcast %cst_41 : f32 to vector<8x96xf32>
    %272 = arith.addf %271, %270 : vector<8x96xf32>
    %273 = arith.divf %271, %272 : vector<8x96xf32>
    %274 = vector.extract_strided_slice %267 {offsets = [0, 96], sizes = [8, 32], strides = [1, 1]} : vector<8x128xf32> to vector<8x32xf32>
    %275 = math.tanh %274 : vector<8x32xf32>
    %276 = vector.extract_strided_slice %273 {offsets = [0, 32], sizes = [8, 32], strides = [1, 1]} : vector<8x96xf32> to vector<8x32xf32>
    %277 = arith.mulf %276, %239 : vector<8x32xf32>
    %278 = vector.extract_strided_slice %273 {offsets = [0, 0], sizes = [8, 32], strides = [1, 1]} : vector<8x96xf32> to vector<8x32xf32>
    %279 = arith.mulf %278, %275 : vector<8x32xf32>
    %280 = arith.addf %277, %279 : vector<8x32xf32>
    %281 = vector.extract_strided_slice %273 {offsets = [0, 64], sizes = [8, 32], strides = [1, 1]} : vector<8x96xf32> to vector<8x32xf32>
    %282 = math.tanh %280 : vector<8x32xf32>
    %283 = arith.mulf %281, %282 : vector<8x32xf32>
    %284 = tpu.concatenate %283, %263 in 1 : vector<8x32xf32>, vector<8x32xf32> -> vector<8x64xf32>
    %285 = arith.truncf %284 : vector<8x64xf32> to vector<8x64xbf16>
    %cst_42 = arith.constant dense<0.000000e+00> : vector<8x128xf32>
    %286 = tpu.matmul %285, %11, %cst_42 {dimension_numbers = #tpu.dot_dimension_numbers<[1], [0], [0], [1], [0, 0, 1, 1], [], []>} : vector<8x64xbf16>, vector<64x128xbf16>, vector<8x128xf32> -> vector<8x128xf32>
    %287 = vector.broadcast %13 : vector<1x128xf32> to vector<8x128xf32>
    %288 = arith.addf %286, %287 : vector<8x128xf32>
    %289 = vector.extract_strided_slice %288 {offsets = [0, 0], sizes = [8, 96], strides = [1, 1]} : vector<8x128xf32> to vector<8x96xf32>
    %290 = arith.negf %289 : vector<8x96xf32>
    %291 = math.exp %290 : vector<8x96xf32>
    %cst_43 = arith.constant 1.000000e+00 : f32
    %292 = vector.broadcast %cst_43 : f32 to vector<8x96xf32>
    %293 = arith.addf %292, %291 : vector<8x96xf32>
    %294 = arith.divf %292, %293 : vector<8x96xf32>
    %295 = vector.extract_strided_slice %288 {offsets = [0, 96], sizes = [8, 32], strides = [1, 1]} : vector<8x128xf32> to vector<8x32xf32>
    %296 = math.tanh %295 : vector<8x32xf32>
    %297 = vector.extract_strided_slice %294 {offsets = [0, 32], sizes = [8, 32], strides = [1, 1]} : vector<8x96xf32> to vector<8x32xf32>
    %298 = arith.mulf %297, %260 : vector<8x32xf32>
    %299 = vector.extract_strided_slice %294 {offsets = [0, 0], sizes = [8, 32], strides = [1, 1]} : vector<8x96xf32> to vector<8x32xf32>
    %300 = arith.mulf %299, %296 : vector<8x32xf32>
    %301 = arith.addf %298, %300 : vector<8x32xf32>
    %302 = vector.extract_strided_slice %294 {offsets = [0, 64], sizes = [8, 32], strides = [1, 1]} : vector<8x96xf32> to vector<8x32xf32>
    %303 = math.tanh %301 : vector<8x32xf32>
    %304 = arith.mulf %302, %303 : vector<8x32xf32>
    %305 = vector.extract_strided_slice %8 {offsets = [56, 0], sizes = [8, 128], strides = [1, 1]} : vector<64x128xf32> to vector<8x128xf32>
    %306 = arith.truncf %283 : vector<8x32xf32> to vector<8x32xbf16>
    %cst_44 = arith.constant dense<0.000000e+00> : vector<8x128xf32>
    %307 = tpu.matmul %306, %9, %cst_44 {dimension_numbers = #tpu.dot_dimension_numbers<[1], [0], [0], [1], [0, 0, 1, 1], [], []>} : vector<8x32xbf16>, vector<32x128xbf16>, vector<8x128xf32> -> vector<8x128xf32>
    %308 = arith.addf %305, %307 : vector<8x128xf32>
    %309 = vector.extract_strided_slice %308 {offsets = [0, 0], sizes = [8, 96], strides = [1, 1]} : vector<8x128xf32> to vector<8x96xf32>
    %310 = arith.negf %309 : vector<8x96xf32>
    %311 = math.exp %310 : vector<8x96xf32>
    %cst_45 = arith.constant 1.000000e+00 : f32
    %312 = vector.broadcast %cst_45 : f32 to vector<8x96xf32>
    %313 = arith.addf %312, %311 : vector<8x96xf32>
    %314 = arith.divf %312, %313 : vector<8x96xf32>
    %315 = vector.extract_strided_slice %308 {offsets = [0, 96], sizes = [8, 32], strides = [1, 1]} : vector<8x128xf32> to vector<8x32xf32>
    %316 = math.tanh %315 : vector<8x32xf32>
    %317 = vector.extract_strided_slice %314 {offsets = [0, 32], sizes = [8, 32], strides = [1, 1]} : vector<8x96xf32> to vector<8x32xf32>
    %318 = arith.mulf %317, %280 : vector<8x32xf32>
    %319 = vector.extract_strided_slice %314 {offsets = [0, 0], sizes = [8, 32], strides = [1, 1]} : vector<8x96xf32> to vector<8x32xf32>
    %320 = arith.mulf %319, %316 : vector<8x32xf32>
    %321 = arith.addf %318, %320 : vector<8x32xf32>
    %322 = vector.extract_strided_slice %314 {offsets = [0, 64], sizes = [8, 32], strides = [1, 1]} : vector<8x96xf32> to vector<8x32xf32>
    %323 = math.tanh %321 : vector<8x32xf32>
    %324 = arith.mulf %322, %323 : vector<8x32xf32>
    %325 = tpu.concatenate %324, %304 in 1 : vector<8x32xf32>, vector<8x32xf32> -> vector<8x64xf32>
    %326 = arith.truncf %325 : vector<8x64xf32> to vector<8x64xbf16>
    %cst_46 = arith.constant dense<0.000000e+00> : vector<8x128xf32>
    %327 = tpu.matmul %326, %11, %cst_46 {dimension_numbers = #tpu.dot_dimension_numbers<[1], [0], [0], [1], [0, 0, 1, 1], [], []>} : vector<8x64xbf16>, vector<64x128xbf16>, vector<8x128xf32> -> vector<8x128xf32>
    %328 = vector.broadcast %13 : vector<1x128xf32> to vector<8x128xf32>
    %329 = arith.addf %327, %328 : vector<8x128xf32>
    %330 = vector.extract_strided_slice %329 {offsets = [0, 0], sizes = [8, 96], strides = [1, 1]} : vector<8x128xf32> to vector<8x96xf32>
    %331 = arith.negf %330 : vector<8x96xf32>
    %332 = math.exp %331 : vector<8x96xf32>
    %cst_47 = arith.constant 1.000000e+00 : f32
    %333 = vector.broadcast %cst_47 : f32 to vector<8x96xf32>
    %334 = arith.addf %333, %332 : vector<8x96xf32>
    %335 = arith.divf %333, %334 : vector<8x96xf32>
    %336 = vector.extract_strided_slice %329 {offsets = [0, 96], sizes = [8, 32], strides = [1, 1]} : vector<8x128xf32> to vector<8x32xf32>
    %337 = math.tanh %336 : vector<8x32xf32>
    %338 = vector.extract_strided_slice %335 {offsets = [0, 32], sizes = [8, 32], strides = [1, 1]} : vector<8x96xf32> to vector<8x32xf32>
    %339 = arith.mulf %338, %301 : vector<8x32xf32>
    %340 = vector.extract_strided_slice %335 {offsets = [0, 0], sizes = [8, 32], strides = [1, 1]} : vector<8x96xf32> to vector<8x32xf32>
    %341 = arith.mulf %340, %337 : vector<8x32xf32>
    %342 = arith.addf %339, %341 : vector<8x32xf32>
    %343 = vector.extract_strided_slice %335 {offsets = [0, 64], sizes = [8, 32], strides = [1, 1]} : vector<8x96xf32> to vector<8x32xf32>
    %344 = math.tanh %342 : vector<8x32xf32>
    %345 = arith.mulf %343, %344 : vector<8x32xf32>
    %c0_48 = arith.constant 0 : index
    %c0_49 = arith.constant 0 : index
    %346 = vector.load %arg5[%c0_48, %c0_49] : memref<33x8xf32, #tpu.memory_space<vmem>>, vector<32x8xf32>
    %cst_50 = arith.constant dense<0.000000e+00> : vector<8x8xf32>
    %347 = tpu.matmul %345, %346, %cst_50 {dimension_numbers = #tpu.dot_dimension_numbers<[1], [0], [0], [1], [0, 0, 1, 1], [], []>} : vector<8x32xf32>, vector<32x8xf32>, vector<8x8xf32> -> vector<8x8xf32>
    %c32 = arith.constant 32 : index
    %c0_51 = arith.constant 0 : index
    %348 = vector.load %arg5[%c32, %c0_51] : memref<33x8xf32, #tpu.memory_space<vmem>>, vector<1x8xf32>
    %349 = vector.broadcast %348 : vector<1x8xf32> to vector<8x8xf32>
    %350 = arith.addf %347, %349 : vector<8x8xf32>
    %c0_52 = arith.constant 0 : index
    %c0_53 = arith.constant 0 : index
    %351 = vector.load %arg6[%c0_52, %c0_53] : memref<8x8xf32, #tpu.memory_space<vmem>>, vector<8x8xf32>
    tpu.vector_store %arg6[%c0_52, %c0_53], %350 {strides = array<i32>} : memref<8x8xf32, #tpu.memory_space<vmem>>, vector<8x8xf32>,
    return
  }
}

</mosaic_0001>

<bundles_post_ra>
// kernel: tpu_custom_call.1
= control target key start
LH: loop header
LB: loop body
LE: loop exit
PB: predicated region body
PF: predicated region fallthrough
CT: control target
= control target key end

     0   :  { %v1393_v3 = vmov 0   ;;  %s1754_s0 = inlined_call_operand.vmem [shape: f32[64,1], index: 0, kind: input, shape index: {}]   ;;  %s1755_s1 = inlined_call_operand.vmem [shape: f32[1,128], index: 1, kind: input, shape index: {}]   ;;  %s1756_s2 = inlined_call_operand.vmem [shape: bf16[32,128], index: 2, kind: input, shape index: {}]   ;;  %s1757_s3 = inlined_call_operand.vmem [shape: bf16[1,64,128], index: 3, kind: input, shape index: {}]   ;;  %s1758_s4 = inlined_call_operand.vmem [shape: f32[2,1,128], index: 4, kind: input, shape index: {}]   ;;  %s1759_s5 = inlined_call_operand.vmem [shape: f32[33,8], index: 5, kind: input, shape index: {}]   ;;  %s1760_s6 = inlined_call_operand.hbm [shape: f32[8,8], index: 6, kind: output, shape index: {}]  }
   0x1   :  { %v1436_v0 = vld [vmem:[%s1756_s2 + $0x8] sm:$0xff]  ;;  %v26_v1 = vld [vmem:[%s1754_s0] sm:$0xff]  ;;  %1229 = vset.pattern.permute.xlu0 %v1393_v3  ;;  %1230 = vset.pattern.permute.xlu1 %v1393_v3 }
   0x2   :  { %v1444_v2 = vld [vmem:[%s1756_s2] sm:$0xff]  ;;  %133 = vmatpush.bf16.msra.mxu0 %v1436_v0  ;;  %37 = vperm.xlu0 %1229, %v26_v1  }
   0x3   :  { %11 = vsyncpa [#allocation3], 0  ;;  %278 = vmatpush.bf16.msra.mxu2 %v1436_v0  ;;  %1231 = vset.pattern.permute.xlu2 %v1393_v3  ;;  %v1457_v4 = vld [vmem:[%s1755_s1] ss:$0 sm:$0xff]  ;;  %s1394_s30 = smov 32   ;;  %v27_v13 = vld [vmem:[%s1754_s0 + $0x8] sm:$0xff] }
   0x4   :  { %v1463_v7 = vld [vmem:[%s1758_s4] ss:$0 sm:$0xff]  ;;  %v1478_v33 = vld [vmem:[%s1757_s3 + $0x18] sm:$0xff]  ;;  %s1395_s11 = smov 64   ;;  %v1488_v37 = vld [vmem:[%s1757_s3 + $0x10] sm:$0xff]  ;;  %vm123_vm4 = vcmask 261120  }
   0x5   :  { %219 = vmatpush.bf16.msra.mxu1 %v1478_v33  ;;  %340 = vmatpush.bf16.msra.mxu3 %v1478_v33  ;;  %v1494_v38 = vld [vmem:[%s1757_s3 + $0x8] sm:$0xff]  ;;  %v1504_v39 = vld [vmem:[%s1757_s3] sm:$0xff]  ;;  %vm211_vm5 = vcmask 523264   ;;  %s1396_s19 = smov 96   ;;  %s1397_s20 = smov [#allocation2]  }
   0x6   :  { %134 = vmatpush.bf16.msra.mxu0 %v1444_v2  ;;  %v1529_v49 = vld [vmem:[%s1758_s4 + $0x1] ss:$0 sm:$0xff]  ;;  %s1150_s21 = sshll.u32 %s1397_s20, 4  ;;  %s1152_s24 = sshll.u32 %s1760_s6, 4  ;;  %s1151_s21 = int_to_ptr.vmem [resolvable:$true] %s1150_s21  ;;  %s1153_s24 = int_to_ptr.hbm [resolvable:$true] %s1152_s24 }
   0x7   :  { %279 = vmatpush.bf16.msra.mxu2 %v1444_v2 }
   0x9   :  { %135 = vmatmul.bf16.vlgmr.msra.gmra.mxu0 %v1393_v3  ;;  %220 = vmatpush.bf16.msra.mxu1 %v1488_v37 }
   0xa   :  { %399 = vmatpush.bf16.msrb.mxu0 %v1436_v0  ;;  %341 = vmatpush.bf16.msra.mxu3 %v1488_v37 }
   0xb   :  { %461 = vmatpush.bf16.msrb.mxu2 %v1478_v33 }
   0xd   :  { %221 = vmatpush.bf16.msra.mxu1 %v1494_v38 }
   0xe   :  { %400 = vmatpush.bf16.msrb.mxu0 %v1444_v2  ;;  %342 = vmatpush.bf16.msra.mxu3 %v1494_v38 }
   0xf   :  { %462 = vmatpush.bf16.msrb.mxu2 %v1488_v37 }
  0x11   :  { %222 = vmatpush.bf16.msra.mxu1 %v1504_v39 }
  0x12   :  { %641 = vmatpush.bf16.msra.mxu0 %v1436_v0  ;;  %343 = vmatpush.bf16.msra.mxu3 %v1504_v39 }
  0x13   :  { %463 = vmatpush.bf16.msrb.mxu2 %v1494_v38 }
  0x15   :  { %520 = vmatpush.bf16.msrb.mxu1 %v1436_v0 }
  0x16   :  { %642 = vmatpush.bf16.msra.mxu0 %v1444_v2  ;;  %582 = vmatpush.bf16.msrb.mxu3 %v1478_v33 }
  0x17   :  { %464 = vmatpush.bf16.msrb.mxu2 %v1504_v39 }
  0x19   :  { %521 = vmatpush.bf16.msrb.mxu1 %v1444_v2 }
  0x1a   :  { %583 = vmatpush.bf16.msrb.mxu3 %v1488_v37 }
  0x1e   :  { %584 = vmatpush.bf16.msrb.mxu3 %v1494_v38 }
  0x22   :  { %585 = vmatpush.bf16.msrb.mxu3 %v1504_v39 }
  0x74   :  { %v38_v5 = vpop.permute.xlu0 %37 }
  0x75   :  { %v78_v6 = vmul.f32 %v1457_v4, %v38_v5 }
  0x77   :  { %v89_v8 = vadd.f32 %v1463_v7, %v78_v6 }
  0x86   :  { %v136_v9 = vpop.f32.mrf.mxu0 }
  0x87   :  { %v140_v10 = vadd.f32 %v136_v9, %v89_v8 }
  0x89   :  { %1236 = vtanh.f32 %v140_v10  ;;  %v1170_v14 = vmul.f32 -1.442695, %v140_v10 }
  0x8b   :  { %1238 = vpow2.f32 %v1170_v14 }
  0x8e   :  { %v138_v11 = vpop.f32.mrf.mxu0 }
  0x8f   :  { %v1237_v12 = vpop.eup %1236 }
  0x90   :  { %163 = vrot.lane.b32.xlu0 %v1237_v12, %s1394_s30 }
  0x91   :  { %v1239_v15 = vpop.eup %1238 }
  0x92   :  { %v144_v16 = vadd.f32 1.0, %v1239_v15 }
  0x94   :  { %1240 = vrcp.f32 %v144_v16  ;;  %v156_v22 = vand.u32 2147483648, %v144_v16  ;;  %vm150_vm1 = vweird.f32 %v144_v16  ;;  %v154_v23 = vand.u32 2147483647, %v144_v16 }
  0x96   :  { %v157_v25 = vor.u32 1.1754944e-38, %v156_v22  ;;  %vm155_vm3 = vcmp.eq.f32.partialorder %v154_v23, 8.507059e+37 }
  0x98   :  { %42 = vperm.xlu0 %1229, %v27_v13  }
  0x9a   :  { %v1241_v17 = vpop.eup %1240 }
  0x9b   :  { %v146_v18 = vmul.f32 %v1241_v17, %v144_v16  ;;  %vm151_vm0 = vweird.f32 %v1241_v17 }
  0x9c   :  { %vm152_vm2 = vmor %vm150_vm1, %vm151_vm0 }
  0x9d   :  { %v147_v19 = vsub.f32 1.0, %v146_v18 }
  0x9f   :  { %v148_v20 = vmul.f32 %v1241_v17, %v147_v19 }
  0xa1   :  { %v149_v21 = vadd.f32 %v1241_v17, %v148_v20 }
  0xa3   :  { %v153_v24 = vsel %vm152_vm2, %v1241_v17, %v149_v21 }
  0xa4   :  { %v158_v27 = vsel %vm155_vm3, %v157_v25, %v153_v24 }
  0xa5   :  { %v161_v29 = vmul.f32 0.0, %v158_v27 }
 0x102   :  { %v164_v26 = vpop.permute.xlu0 %163 }
 0x103   :  { %v166_v28 = vmul.f32 %v164_v26, %v158_v27 }
 0x105   :  { %168 = vrot.lane.b32.xlu1 %v166_v28, %s1394_s30 }
 0x10a   :  { %v43_v44 = vpop.permute.xlu0 %42 }
 0x10b   :  { %v79_v45 = vmul.f32 %v1457_v4, %v43_v44 }
 0x10d   :  { %v90_v46 = vadd.f32 %v1463_v7, %v79_v45 }
 0x177   :  { %v169_v30 = vpop.permute.xlu1 %168 }
 0x178   :  { %v1471_v31 = vadd.f32 %v169_v30, %v161_v29 }
 0x17a   :  { %1242 = vtanh.f32 %v1471_v31 }
 0x180   :  { %v1243_v32 = vpop.eup %1242 }
 0x181   :  { %174 = vrot.lane.b32.xlu1 %v1243_v32, %s1394_s30 }
 0x1f3   :  { %v175_v34 = vpop.permute.xlu1 %174 }
 0x1f4   :  { %v177_v35 = vmul.f32 %v175_v34, %v158_v27 }
 0x1f6   :  { %v265_v36 = vpack.c.bf16 %v177_v35, %v177_v35 }
 0x1f8   :  { %267 = vrot.lane.b32.xlu2 %v265_v36, %s1395_s11 }
 0x200   :  { %179 = vrot.lane.b32.xlu2 %v177_v35, %s1395_s11 }
 0x252   :  { %v268_v40 = vpop.permute.xlu2 %267 }
 0x253   :  { %1189 = vmatmul.msk.bf16.vlgmr.msra.gmra.mxu2 %vm123_vm4, %v268_v40 }
 0x254   :  { %703 = vmatpush.bf16.msra.mxu2 %v1478_v33 }
 0x258   :  { %704 = vmatpush.bf16.msra.mxu2 %v1488_v37 }
 0x25a   :  { %v180_v41 = vpop.permute.xlu2 %179 }
 0x25b   :  { %v182_v42 = vsel %vm123_vm4, %v180_v41, 0.0 }
 0x25c   :  { %v183_v43 = vpack.c.bf16 %v182_v42, %v182_v42  ;;  %705 = vmatpush.bf16.msra.mxu2 %v1494_v38 }
 0x25e   :  { %1187 = vmatmul.msk.bf16.vlgmr.msra.gmra.mxu1 %vm211_vm5, %v183_v43  ;;  %v28_v43 = vld [vmem:[%s1754_s0 + $0x10] sm:$0xff] }
 0x25f   :  { %762 = vmatpush.bf16.msra.mxu1 %v1436_v0 }
 0x260   :  { %706 = vmatpush.bf16.msra.mxu2 %v1504_v39 }
 0x263   :  { %763 = vmatpush.bf16.msra.mxu1 %v1444_v2 }
 0x2d6   :  { %v281_v47 = vpop.f32.mrf.mxu2 }
 0x2d7   :  { %v285_v48 = vadd.f32 %v281_v47, %v90_v46 }
 0x2d9   :  { %1244 = vtanh.f32 %v285_v48  ;;  %v1190_v56 = vmul.f32 -1.442695, %v285_v48 }
 0x2db   :  { %v224_v50 = vpop.f32.mrf.mxu1 }
 0x2dc   :  { %v225_v51 = vadd.f32 %v1529_v49, %v224_v50 }
 0x2de   :  { %1246 = vtanh.f32 %v225_v51  ;;  %v283_v52 = vpop.f32.mrf.mxu2  ;;  %v1188_v61 = vmul.f32 -1.442695, %v225_v51 }
 0x2df   :  { %v1245_v53 = vpop.eup %1244  ;;  %1248 = vpow2.f32 %v1190_v56 }
 0x2e0   :  { %308 = vrot.lane.b32.xlu2 %v1245_v53, %s1394_s30 }
 0x2e3   :  { %v226_v54 = vpop.f32.mrf.mxu1 }
 0x2e4   :  { %v1247_v55 = vpop.eup %1246 }
 0x2e5   :  { %250 = vrot.lane.b32.xlu1 %v1247_v55, %s1394_s30  ;;  %v1249_v57 = vpop.eup %1248 }
 0x2e6   :  { %v289_v58 = vadd.f32 1.0, %v1249_v57 }
 0x2e8   :  { %1250 = vrcp.f32 %v289_v58  ;;  %v301_v5 = vand.u32 2147483648, %v289_v58  ;;  %vm295_vm7 = vweird.f32 %v289_v58  ;;  %v299_v6 = vand.u32 2147483647, %v289_v58 }
 0x2e9   :  { %1252 = vpow2.f32 %v1188_v61 }
 0x2ea   :  { %v302_v10 = vor.u32 1.1754944e-38, %v301_v5  ;;  %vm300_vm9 = vcmp.eq.f32.partialorder %v299_v6, 8.507059e+37 }
 0x2ee   :  { %v1251_v59 = vpop.eup %1250 }
 0x2ef   :  { %v291_v60 = vmul.f32 %v1251_v59, %v289_v58  ;;  %vm296_vm6 = vweird.f32 %v1251_v59  ;;  %v1253_v3 = vpop.eup %1252 }
 0x2f0   :  { %vm297_vm8 = vmor %vm295_vm7, %vm296_vm6  ;;  %v231_v8 = vadd.f32 1.0, %v1253_v3 }
 0x2f1   :  { %v292_v62 = vsub.f32 1.0, %v291_v60 }
 0x2f2   :  { %1254 = vrcp.f32 %v231_v8  ;;  %v243_v19 = vand.u32 2147483648, %v231_v8  ;;  %vm237_vm11 = vweird.f32 %v231_v8  ;;  %v241_v20 = vand.u32 2147483647, %v231_v8 }
 0x2f3   :  { %v293_v63 = vmul.f32 %v1251_v59, %v292_v62 }
 0x2f4   :  { %v244_v22 = vor.u32 1.1754944e-38, %v243_v19  ;;  %vm242_vm13 = vcmp.eq.f32.partialorder %v241_v20, 8.507059e+37 }
 0x2f5   :  { %v294_v1 = vadd.f32 %v1251_v59, %v293_v63 }
 0x2f7   :  { %v298_v9 = vsel %vm297_vm8, %v1251_v59, %v294_v1 }
 0x2f8   :  { %v303_v11 = vsel %vm300_vm9, %v302_v10, %v298_v9  ;;  %v1255_v14 = vpop.eup %1254 }
 0x2f9   :  { %v233_v15 = vmul.f32 %v1255_v14, %v231_v8  ;;  %vm238_vm10 = vweird.f32 %v1255_v14  ;;  %v306_v26 = vmul.f32 %v303_v11, %v1471_v31 }
 0x2fa   :  { %vm239_vm12 = vmor %vm237_vm11, %vm238_vm10 }
 0x2fb   :  { %v234_v16 = vsub.f32 1.0, %v233_v15 }
 0x2fd   :  { %v235_v17 = vmul.f32 %v1255_v14, %v234_v16 }
 0x2ff   :  { %v236_v18 = vadd.f32 %v1255_v14, %v235_v17 }
 0x301   :  { %v240_v21 = vsel %vm239_vm12, %v1255_v14, %v236_v18 }
 0x302   :  { %v245_v24 = vsel %vm242_vm13, %v244_v22, %v240_v21 }
 0x303   :  { %v248_v30 = vmul.f32 0.0, %v245_v24 }
 0x33a   :  { %v309_v12 = vpop.permute.xlu2 %308 }
 0x33b   :  { %v311_v13 = vmul.f32 %v309_v12, %v303_v11 }
 0x33d   :  { %313 = vrot.lane.b32.xlu1 %v311_v13, %s1394_s30 }
 0x357   :  { %v251_v23 = vpop.permute.xlu1 %250 }
 0x358   :  { %v253_v25 = vmul.f32 %v251_v23, %v245_v24 }
 0x35a   :  { %255 = vrot.lane.b32.xlu0 %v253_v25, %s1394_s30 }
 0x3af   :  { %v314_v27 = vpop.permute.xlu1 %313 }
 0x3b0   :  { %v1537_v28 = vadd.f32 %v314_v27, %v306_v26 }
 0x3b2   :  { %1256 = vtanh.f32 %v1537_v28 }
 0x3b8   :  { %v1257_v29 = vpop.eup %1256 }
 0x3b9   :  { %319 = vrot.lane.b32.xlu0 %v1257_v29, %s1394_s30 }
 0x3cc   :  { %v256_v32 = vpop.permute.xlu0 %255 }
 0x3cd   :  { %v1541_v34 = vadd.f32 %v256_v32, %v248_v30 }
 0x3cf   :  { %1258 = vtanh.f32 %v1541_v34 }
 0x3d5   :  { %v1259_v35 = vpop.eup %1258 }
 0x3d6   :  { %261 = vrot.lane.b32.xlu2 %v1259_v35, %s1394_s30 }
 0x42b   :  { %v320_v36 = vpop.permute.xlu0 %319 }
 0x42c   :  { %v322_v40 = vmul.f32 %v320_v36, %v303_v11 }
 0x42e   :  { %v386_v31 = vpack.c.bf16 %v322_v40, %v322_v40  ;;  %324 = vrot.lane.b32.xlu1 %v322_v40, %s1395_s11 }
 0x430   :  { %388 = vrot.lane.b32.xlu0 %v386_v31, %s1395_s11  ;;  %v262_v41 = vpop.permute.xlu2 %261 }
 0x431   :  { %v264_v42 = vmul.f32 %v262_v41, %v245_v24 }
 0x433   :  { %328 = vrot.lane.b32.xlu2 %v264_v42, %s1396_s19 }
 0x436   :  { %47 = vperm.xlu1 %1230, %v28_v43  }
 0x48d   :  { %v329_v44 = vpop.permute.xlu2 %328 }
 0x4a0   :  { %v325_v45 = vpop.permute.xlu1 %324 }
 0x4a1   :  { %v331_v46 = vsel %vm123_vm4, %v325_v45, %v329_v44 }
 0x4a2   :  { %v332_v47 = vpack.c.bf16 %v331_v46, %v331_v46  ;;  %v389_v48 = vpop.permute.xlu0 %388 }
 0x4a3   :  { %1193 = vmatmul.msk.bf16.vlgmr.msrb.gmra.mxu0 %vm123_vm4, %v389_v48  ;;  %v29_v48 = vld [vmem:[%s1754_s0 + $0x18] sm:$0xff] }
 0x4a4   :  { %1191 = vmatmul.msk.bf16.vlgmr.msra.gmra.mxu3 %vm211_vm5, %v332_v47  ;;  %883 = vmatpush.bf16.msrb.mxu0 %v1436_v0 }
 0x4a5   :  { %824 = vmatpush.bf16.msra.mxu3 %v1478_v33 }
 0x4a8   :  { %884 = vmatpush.bf16.msrb.mxu0 %v1444_v2  ;;  %v48_v50 = vpop.permute.xlu1 %47 }
 0x4a9   :  { %825 = vmatpush.bf16.msra.mxu3 %v1488_v37  ;;  %v80_v51 = vmul.f32 %v1457_v4, %v48_v50 }
 0x4ab   :  { %v91_v52 = vadd.f32 %v1463_v7, %v80_v51 }
 0x4ad   :  { %826 = vmatpush.bf16.msra.mxu3 %v1494_v38 }
 0x4b1   :  { %827 = vmatpush.bf16.msra.mxu3 %v1504_v39 }
 0x520   :  { %v402_v53 = vpop.f32.mrf.mxu0 }
 0x521   :  { %v406_v54 = vadd.f32 %v402_v53, %v91_v52 }
 0x523   :  { %1260 = vtanh.f32 %v406_v54  ;;  %v1194_v1 = vmul.f32 -1.442695, %v406_v54 }
 0x527   :  { %v345_v55 = vpop.f32.mrf.mxu3 }
 0x528   :  { %v346_v56 = vadd.f32 %v1529_v49, %v345_v55  ;;  %v404_v57 = vpop.f32.mrf.mxu0 }
 0x529   :  { %v1261_v58 = vpop.eup %1260 }
 0x52a   :  { %1262 = vtanh.f32 %v346_v56  ;;  %429 = vrot.lane.b32.xlu0 %v1261_v58, %s1394_s30  ;;  %v1192_v61 = vmul.f32 -1.442695, %v346_v56 }
 0x52c   :  { %1264 = vpow2.f32 %v1192_v61 }
 0x52f   :  { %v347_v59 = vpop.f32.mrf.mxu3 }
 0x530   :  { %v1263_v60 = vpop.eup %1262 }
 0x531   :  { %371 = vrot.lane.b32.xlu2 %v1263_v60, %s1394_s30 }
 0x532   :  { %v1265_v62 = vpop.eup %1264 }
 0x533   :  { %v352_v63 = vadd.f32 1.0, %v1265_v62 }
 0x535   :  { %1266 = vrcp.f32 %v352_v63  ;;  %v364_v12 = vand.u32 2147483648, %v352_v63  ;;  %vm358_vm15 = vweird.f32 %v352_v63  ;;  %v362_v14 = vand.u32 2147483647, %v352_v63 }
 0x536   :  { %1268 = vpow2.f32 %v1194_v1 }
 0x537   :  { %v365_v16 = vor.u32 1.1754944e-38, %v364_v12  ;;  %vm363_vm1 = vcmp.eq.f32.partialorder %v362_v14, 8.507059e+37 }
 0x53b   :  { %v1267_v3 = vpop.eup %1266 }
 0x53c   :  { %v354_v5 = vmul.f32 %v1267_v3, %v352_v63  ;;  %v1269_v6 = vpop.eup %1268  ;;  %vm359_vm14 = vweird.f32 %v1267_v3 }
 0x53d   :  { %v410_v8 = vadd.f32 1.0, %v1269_v6  ;;  %vm360_vm0 = vmor %vm358_vm15, %vm359_vm14 }
 0x53e   :  { %v355_v9 = vsub.f32 1.0, %v354_v5 }
 0x53f   :  { %1270 = vrcp.f32 %v410_v8  ;;  %v422_v24 = vand.u32 2147483648, %v410_v8  ;;  %vm416_vm3 = vweird.f32 %v410_v8  ;;  %v420_v25 = vand.u32 2147483647, %v410_v8 }
 0x540   :  { %v356_v10 = vmul.f32 %v1267_v3, %v355_v9 }
 0x541   :  { %v423_v27 = vor.u32 1.1754944e-38, %v422_v24  ;;  %vm421_vm7 = vcmp.eq.f32.partialorder %v420_v25, 8.507059e+37 }
 0x542   :  { %v357_v11 = vadd.f32 %v1267_v3, %v356_v10 }
 0x544   :  { %v361_v15 = vsel %vm360_vm0, %v1267_v3, %v357_v11 }
 0x545   :  { %v1271_v13 = vpop.eup %1270  ;;  %v366_v19 = vsel %vm363_vm1, %v365_v16, %v361_v15 }
 0x546   :  { %v412_v17 = vmul.f32 %v1271_v13, %v410_v8  ;;  %vm417_vm2 = vweird.f32 %v1271_v13  ;;  %v369_v31 = vmul.f32 %v366_v19, %v1541_v34 }
 0x547   :  { %vm418_vm6 = vmor %vm416_vm3, %vm417_vm2 }
 0x548   :  { %v413_v21 = vsub.f32 1.0, %v412_v17 }
 0x54a   :  { %v414_v22 = vmul.f32 %v1271_v13, %v413_v21 }
 0x54c   :  { %v415_v23 = vadd.f32 %v1271_v13, %v414_v22 }
 0x54e   :  { %v419_v26 = vsel %vm418_vm6, %v1271_v13, %v415_v23 }
 0x54f   :  { %v424_v30 = vsel %vm421_vm7, %v423_v27, %v419_v26 }
 0x550   :  { %v427_v35 = vmul.f32 %v424_v30, %v1537_v28 }
 0x58b   :  { %v372_v18 = vpop.permute.xlu2 %371 }
 0x58c   :  { %v374_v20 = vmul.f32 %v372_v18, %v366_v19 }
 0x58e   :  { %376 = vrot.lane.b32.xlu1 %v374_v20, %s1394_s30 }
 0x59c   :  { %v430_v29 = vpop.permute.xlu0 %429 }
 0x59d   :  { %v432_v32 = vmul.f32 %v430_v29, %v424_v30 }
 0x59f   :  { %434 = vrot.lane.b32.xlu2 %v432_v32, %s1394_s30 }
 0x5f9   :  { %v435_v36 = vpop.permute.xlu2 %434 }
 0x5fa   :  { %v1568_v40 = vadd.f32 %v435_v36, %v427_v35 }
 0x5fc   :  { %1272 = vtanh.f32 %v1568_v40 }
 0x600   :  { %v377_v41 = vpop.permute.xlu1 %376 }
 0x601   :  { %v1572_v42 = vadd.f32 %v377_v41, %v369_v31 }
 0x602   :  { %v1273_v43 = vpop.eup %1272 }
 0x603   :  { %1274 = vtanh.f32 %v1572_v42  ;;  %440 = vrot.lane.b32.xlu1 %v1273_v43, %s1394_s30 }
 0x609   :  { %v1275_v44 = vpop.eup %1274 }
 0x60a   :  { %382 = vrot.lane.b32.xlu0 %v1275_v44, %s1394_s30 }
 0x675   :  { %v441_v45 = vpop.permute.xlu1 %440 }
 0x676   :  { %v443_v28 = vmul.f32 %v441_v45, %v424_v30 }
 0x678   :  { %v507_v46 = vpack.c.bf16 %v443_v28, %v443_v28  ;;  %445 = vrot.lane.b32.xlu2 %v443_v28, %s1395_s11 }
 0x67a   :  { %509 = vrot.lane.b32.xlu1 %v507_v46, %s1395_s11 }
 0x67c   :  { %v383_v47 = vpop.permute.xlu0 %382 }
 0x67d   :  { %v385_v34 = vmul.f32 %v383_v47, %v366_v19 }
 0x67f   :  { %449 = vrot.lane.b32.xlu0 %v385_v34, %s1396_s19 }
 0x680   :  { %52 = vperm.xlu2 %1231, %v29_v48  }
 0x6d2   :  { %v446_v51 = vpop.permute.xlu2 %445 }
 0x6da   :  { %v53_v55 = vpop.permute.xlu2 %52 }
 0x6ec   :  { %v510_v50 = vpop.permute.xlu1 %509 }
 0x6ed   :  { %1197 = vmatmul.msk.bf16.vlgmr.msrb.gmra.mxu1 %vm123_vm4, %v510_v50 }
 0x6ee   :  { %1004 = vmatpush.bf16.msrb.mxu1 %v1436_v0  ;;  %v81_v0 = vmul.f32 %v1457_v4, %v53_v55 }
 0x6f0   :  { %v92_v56 = vadd.f32 %v1463_v7, %v81_v0 }
 0x6f1   :  { %v450_v52 = vpop.permute.xlu0 %449 }
 0x6f2   :  { %v452_v53 = vsel %vm123_vm4, %v446_v51, %v450_v52  ;;  %1005 = vmatpush.bf16.msrb.mxu1 %v1444_v2 }
 0x6f3   :  { %v453_v54 = vpack.c.bf16 %v452_v53, %v452_v53 }
 0x6f5   :  { %1195 = vmatmul.msk.bf16.vlgmr.msrb.gmra.mxu2 %vm211_vm5, %v453_v54 }
 0x6f6   :  { %945 = vmatpush.bf16.msrb.mxu2 %v1478_v33 }
 0x6fa   :  { %946 = vmatpush.bf16.msrb.mxu2 %v1488_v37 }
 0x6fe   :  { %947 = vmatpush.bf16.msrb.mxu2 %v1494_v38 }
 0x702   :  { %948 = vmatpush.bf16.msrb.mxu2 %v1504_v39 }
 0x76a   :  { %v523_v57 = vpop.f32.mrf.mxu1 }
 0x76b   :  { %v527_v58 = vadd.f32 %v523_v57, %v92_v56 }
 0x76d   :  { %1276 = vtanh.f32 %v527_v58  ;;  %v1198_v1 = vmul.f32 -1.442695, %v527_v58 }
 0x772   :  { %v525_v2 = vpop.f32.mrf.mxu1 }
 0x773   :  { %v1277_v59 = vpop.eup %1276 }
 0x774   :  { %550 = vrot.lane.b32.xlu1 %v1277_v59, %s1394_s30 }
 0x778   :  { %v466_v60 = vpop.f32.mrf.mxu2 }
 0x779   :  { %v467_v61 = vadd.f32 %v1529_v49, %v466_v60 }
 0x77b   :  { %1278 = vtanh.f32 %v467_v61  ;;  %v1196_v6 = vmul.f32 -1.442695, %v467_v61 }
 0x77c   :  { %1280 = vpow2.f32 %v1198_v1 }
 0x780   :  { %v468_v62 = vpop.f32.mrf.mxu2 }
 0x781   :  { %v1279_v63 = vpop.eup %1278 }
 0x782   :  { %492 = vrot.lane.b32.xlu0 %v1279_v63, %s1394_s30  ;;  %v1281_v3 = vpop.eup %1280 }
 0x783   :  { %v531_v5 = vadd.f32 1.0, %v1281_v3 }
 0x785   :  { %1282 = vrcp.f32 %v531_v5  ;;  %v543_v16 = vand.u32 2147483648, %v531_v5  ;;  %vm537_vm9 = vweird.f32 %v531_v5  ;;  %v541_v17 = vand.u32 2147483647, %v531_v5 }
 0x786   :  { %1284 = vpow2.f32 %v1196_v6 }
 0x787   :  { %v544_v20 = vor.u32 1.1754944e-38, %v543_v16  ;;  %vm542_vm11 = vcmp.eq.f32.partialorder %v541_v17, 8.507059e+37 }
 0x78b   :  { %v1283_v8 = vpop.eup %1282 }
 0x78c   :  { %v1285_v9 = vpop.eup %1284  ;;  %v533_v10 = vmul.f32 %v1283_v8, %v531_v5  ;;  %vm538_vm8 = vweird.f32 %v1283_v8 }
 0x78d   :  { %v473_v11 = vadd.f32 1.0, %v1285_v9  ;;  %vm539_vm10 = vmor %vm537_vm9, %vm538_vm8 }
 0x78e   :  { %v534_v12 = vsub.f32 1.0, %v533_v10 }
 0x78f   :  { %1286 = vrcp.f32 %v473_v11  ;;  %v485_v27 = vand.u32 2147483648, %v473_v11  ;;  %vm479_vm13 = vweird.f32 %v473_v11  ;;  %v483_v29 = vand.u32 2147483647, %v473_v11 }
 0x790   :  { %v535_v13 = vmul.f32 %v1283_v8, %v534_v12 }
 0x791   :  { %v486_v32 = vor.u32 1.1754944e-38, %v485_v27  ;;  %vm484_vm15 = vcmp.eq.f32.partialorder %v483_v29, 8.507059e+37 }
 0x792   :  { %v536_v15 = vadd.f32 %v1283_v8, %v535_v13 }
 0x794   :  { %v540_v19 = vsel %vm539_vm10, %v1283_v8, %v536_v15 }
 0x795   :  { %v1287_v14 = vpop.eup %1286  ;;  %v545_v23 = vsel %vm542_vm11, %v544_v20, %v540_v19 }
 0x796   :  { %v475_v18 = vmul.f32 %v1287_v14, %v473_v11  ;;  %vm480_vm12 = vweird.f32 %v1287_v14  ;;  %v548_v28 = vmul.f32 %v545_v23, %v1568_v40  ;;  %v30_v40 = vld [vmem:[%s1754_s0 + $0x20] sm:$0xff] }
 0x797   :  { %vm481_vm14 = vmor %vm479_vm13, %vm480_vm12 }
 0x798   :  { %v476_v21 = vsub.f32 1.0, %v475_v18 }
 0x79a   :  { %v477_v25 = vmul.f32 %v1287_v14, %v476_v21 }
 0x79c   :  { %v478_v26 = vadd.f32 %v1287_v14, %v477_v25 }
 0x79e   :  { %v482_v30 = vsel %vm481_vm14, %v1287_v14, %v478_v26 }
 0x79f   :  { %v487_v36 = vsel %vm484_vm15, %v486_v32, %v482_v30 }
 0x7a0   :  { %v490_v41 = vmul.f32 %v487_v36, %v1572_v42 }
 0x7e6   :  { %v551_v22 = vpop.permute.xlu1 %550 }
 0x7e7   :  { %v553_v24 = vmul.f32 %v551_v22, %v545_v23 }
 0x7e9   :  { %555 = vrot.lane.b32.xlu0 %v553_v24, %s1394_s30 }
 0x7f4   :  { %v493_v35 = vpop.permute.xlu0 %492 }
 0x7f5   :  { %v495_v31 = vmul.f32 %v493_v35, %v487_v36 }
 0x7f7   :  { %497 = vrot.lane.b32.xlu2 %v495_v31, %s1394_s30 }
 0x851   :  { %v498_v43 = vpop.permute.xlu2 %497 }
 0x852   :  { %v1600_v44 = vadd.f32 %v498_v43, %v490_v41 }
 0x854   :  { %1288 = vtanh.f32 %v1600_v44 }
 0x85a   :  { %v1289_v45 = vpop.eup %1288 }
 0x85b   :  { %v556_v46 = vpop.permute.xlu0 %555  ;;  %503 = vrot.lane.b32.xlu1 %v1289_v45, %s1394_s30 }
 0x85c   :  { %v1605_v47 = vadd.f32 %v556_v46, %v548_v28 }
 0x85e   :  { %1290 = vtanh.f32 %v1605_v47 }
 0x864   :  { %v1291_v34 = vpop.eup %1290 }
 0x865   :  { %561 = vrot.lane.b32.xlu2 %v1291_v34, %s1394_s30 }
 0x8bf   :  { %v562_v48 = vpop.permute.xlu2 %561 }
 0x8c0   :  { %v564_v42 = vmul.f32 %v562_v48, %v545_v23 }
 0x8c2   :  { %v628_v50 = vpack.c.bf16 %v564_v42, %v564_v42  ;;  %566 = vrot.lane.b32.xlu0 %v564_v42, %s1395_s11 }
 0x8c4   :  { %630 = vrot.lane.b32.xlu2 %v628_v50, %s1395_s11 }
 0x8ca   :  { %57 = vperm.xlu0 %1229, %v30_v40   ;;  %v31_v40 = vld [vmem:[%s1754_s0 + $0x28] sm:$0xff] }
 0x8cd   :  { %v504_v51 = vpop.permute.xlu1 %503 }
 0x8ce   :  { %v506_v52 = vmul.f32 %v504_v51, %v487_v36 }
 0x8d0   :  { %570 = vrot.lane.b32.xlu1 %v506_v52, %s1396_s19 }
 0x91e   :  { %v631_v53 = vpop.permute.xlu2 %630 }
 0x91f   :  { %1201 = vmatmul.msk.bf16.vlgmr.msra.gmra.mxu0 %vm123_vm4, %v631_v53 }
 0x934   :  { %v567_v54 = vpop.permute.xlu0 %566 }
 0x93c   :  { %v58_v57 = vpop.permute.xlu0 %57 }
 0x93d   :  { %v82_v58 = vmul.f32 %v1457_v4, %v58_v57 }
 0x93f   :  { %v93_v2 = vadd.f32 %v1463_v7, %v82_v58 }
 0x942   :  { %v571_v55 = vpop.permute.xlu1 %570 }
 0x943   :  { %v573_v0 = vsel %vm123_vm4, %v567_v54, %v571_v55 }
 0x944   :  { %v574_v56 = vpack.c.bf16 %v573_v0, %v573_v0 }
 0x946   :  { %1199 = vmatmul.msk.bf16.vlgmr.msrb.gmra.mxu3 %vm211_vm5, %v574_v56 }
 0x947   :  { %1066 = vmatpush.bf16.msrb.mxu3 %v1478_v33 }
 0x94b   :  { %1067 = vmatpush.bf16.msrb.mxu3 %v1488_v37 }
 0x94f   :  { %1068 = vmatpush.bf16.msrb.mxu3 %v1494_v38 }
 0x953   :  { %1069 = vmatpush.bf16.msrb.mxu3 %v1504_v39 }
 0x99c   :  { %v644_v59 = vpop.f32.mrf.mxu0 }
 0x99d   :  { %v648_v60 = vadd.f32 %v644_v59, %v93_v2 }
 0x99f   :  { %1292 = vtanh.f32 %v648_v60  ;;  %v1202_v1 = vmul.f32 -1.442695, %v648_v60 }
 0x9a4   :  { %v646_v61 = vpop.f32.mrf.mxu0 }
 0x9a5   :  { %v1293_v62 = vpop.eup %1292 }
 0x9a6   :  { %671 = vrot.lane.b32.xlu2 %v1293_v62, %s1394_s30 }
 0x9c9   :  { %v587_v63 = vpop.f32.mrf.mxu3 }
 0x9ca   :  { %v588_v33 = vadd.f32 %v1529_v49, %v587_v63 }
 0x9cc   :  { %1294 = vtanh.f32 %v588_v33  ;;  %v1200_v18 = vmul.f32 -1.442695, %v588_v33 }
 0x9cd   :  { %1296 = vpow2.f32 %v1202_v1 }
 0x9d1   :  { %v589_v37 = vpop.f32.mrf.mxu3 }
 0x9d2   :  { %v1295_v38 = vpop.eup %1294 }
 0x9d3   :  { %613 = vrot.lane.b32.xlu1 %v1295_v38, %s1394_s30  ;;  %v1297_v39 = vpop.eup %1296 }
 0x9d4   :  { %v652_v3 = vadd.f32 1.0, %v1297_v39 }
 0x9d6   :  { %1298 = vrcp.f32 %v652_v3  ;;  %v664_v11 = vand.u32 2147483648, %v652_v3  ;;  %vm658_vm1 = vweird.f32 %v652_v3  ;;  %v662_v12 = vand.u32 2147483647, %v652_v3 }
 0x9d7   :  { %1300 = vpow2.f32 %v1200_v18 }
 0x9d8   :  { %v665_v14 = vor.u32 1.1754944e-38, %v664_v11  ;;  %vm663_vm3 = vcmp.eq.f32.partialorder %v662_v12, 8.507059e+37 }
 0x9dc   :  { %v1299_v5 = vpop.eup %1298 }
 0x9dd   :  { %v654_v6 = vmul.f32 %v1299_v5, %v652_v3  ;;  %vm659_vm0 = vweird.f32 %v1299_v5  ;;  %v1301_v19 = vpop.eup %1300 }
 0x9de   :  { %vm660_vm2 = vmor %vm658_vm1, %vm659_vm0  ;;  %v594_v20 = vadd.f32 1.0, %v1301_v19 }
 0x9df   :  { %v655_v8 = vsub.f32 1.0, %v654_v6 }
 0x9e0   :  { %1302 = vrcp.f32 %v594_v20  ;;  %v606_v26 = vand.u32 2147483648, %v594_v20  ;;  %vm600_vm7 = vweird.f32 %v594_v20  ;;  %v604_v27 = vand.u32 2147483647, %v594_v20 }
 0x9e1   :  { %v656_v9 = vmul.f32 %v1299_v5, %v655_v8 }
 0x9e2   :  { %v607_v30 = vor.u32 1.1754944e-38, %v606_v26  ;;  %vm605_vm9 = vcmp.eq.f32.partialorder %v604_v27, 8.507059e+37 }
 0x9e3   :  { %v657_v10 = vadd.f32 %v1299_v5, %v656_v9 }
 0x9e5   :  { %v661_v13 = vsel %vm660_vm2, %v1299_v5, %v657_v10 }
 0x9e6   :  { %v666_v16 = vsel %vm663_vm3, %v665_v14, %v661_v13  ;;  %v1303_v21 = vpop.eup %1302 }
 0x9e7   :  { %v596_v22 = vmul.f32 %v1303_v21, %v594_v20  ;;  %vm601_vm6 = vweird.f32 %v1303_v21  ;;  %v669_v31 = vmul.f32 %v666_v16, %v1605_v47 }
 0x9e8   :  { %vm602_vm8 = vmor %vm600_vm7, %vm601_vm6 }
 0x9e9   :  { %v597_v23 = vsub.f32 1.0, %v596_v22 }
 0x9eb   :  { %v598_v24 = vmul.f32 %v1303_v21, %v597_v23 }
 0x9ed   :  { %v599_v25 = vadd.f32 %v1303_v21, %v598_v24 }
 0x9ef   :  { %v603_v29 = vsel %vm602_vm8, %v1303_v21, %v599_v25 }
 0x9f0   :  { %v608_v35 = vsel %vm605_vm9, %v607_v30, %v603_v29 }
 0x9f1   :  { %v611_v28 = vmul.f32 %v608_v35, %v1600_v44 }
 0xa00   :  { %v672_v15 = vpop.permute.xlu2 %671 }
 0xa01   :  { %v674_v17 = vmul.f32 %v672_v15, %v666_v16 }
 0xa03   :  { %676 = vrot.lane.b32.xlu1 %v674_v17, %s1394_s30 }
 0xa45   :  { %v614_v32 = vpop.permute.xlu1 %613 }
 0xa46   :  { %v616_v36 = vmul.f32 %v614_v32, %v608_v35 }
 0xa48   :  { %618 = vrot.lane.b32.xlu0 %v616_v36, %s1394_s30 }
 0xa75   :  { %v677_v41 = vpop.permute.xlu1 %676 }
 0xa76   :  { %v1630_v43 = vadd.f32 %v677_v41, %v669_v31 }
 0xa78   :  { %1304 = vtanh.f32 %v1630_v43 }
 0xa7e   :  { %v1305_v45 = vpop.eup %1304 }
 0xa7f   :  { %682 = vrot.lane.b32.xlu0 %v1305_v45, %s1394_s30 }
 0xaba   :  { %v619_v46 = vpop.permute.xlu0 %618 }
 0xabb   :  { %v1635_v34 = vadd.f32 %v619_v46, %v611_v28 }
 0xabd   :  { %1306 = vtanh.f32 %v1635_v34 }
 0xac3   :  { %v1307_v48 = vpop.eup %1306 }
 0xac4   :  { %624 = vrot.lane.b32.xlu2 %v1307_v48, %s1394_s30 }
 0xaf1   :  { %v683_v42 = vpop.permute.xlu0 %682 }
 0xaf2   :  { %v685_v47 = vmul.f32 %v683_v42, %v666_v16 }
 0xaf4   :  { %v749_v50 = vpack.c.bf16 %v685_v47, %v685_v47  ;;  %687 = vrot.lane.b32.xlu1 %v685_v47, %s1395_s11  ;;  %v32_v47 = vld [vmem:[%s1754_s0 + $0x30] sm:$0xff] }
 0xaf6   :  { %751 = vrot.lane.b32.xlu0 %v749_v50, %s1395_s11 }
 0xafc   :  { %62 = vperm.xlu1 %1230, %v31_v40  }
 0xb1e   :  { %v625_v44 = vpop.permute.xlu2 %624 }
 0xb1f   :  { %v627_v51 = vmul.f32 %v625_v44, %v608_v35 }
 0xb21   :  { %691 = vrot.lane.b32.xlu2 %v627_v51, %s1396_s19 }
 0xb66   :  { %v688_v53 = vpop.permute.xlu1 %687 }
 0xb68   :  { %v752_v52 = vpop.permute.xlu0 %751 }
 0xb69   :  { %1205 = vmatmul.msk.bf16.vlgmr.msra.gmra.mxu1 %vm123_vm4, %v752_v52 }
 0xb6e   :  { %v63_v56 = vpop.permute.xlu1 %62 }
 0xb6f   :  { %v83_v57 = vmul.f32 %v1457_v4, %v63_v56  ;;  %v1683_v56 = vld [vmem:[%s1758_s4] ss:$0 sm:$0xff] }
 0xb71   :  { %v94_v58 = vadd.f32 %v1463_v7, %v83_v57 }
 0xb7b   :  { %v692_v54 = vpop.permute.xlu2 %691 }
 0xb7c   :  { %v694_v55 = vsel %vm123_vm4, %v688_v53, %v692_v54 }
 0xb7d   :  { %v695_v0 = vpack.c.bf16 %v694_v55, %v694_v55  ;;  %v1677_v55 = vld [vmem:[%s1755_s1] ss:$0 sm:$0xff] }
 0xb7f   :  { %1203 = vmatmul.msk.bf16.vlgmr.msra.gmra.mxu2 %vm211_vm5, %v695_v0 }
 0xbe6   :  { %v765_v2 = vpop.f32.mrf.mxu1 }
 0xbe7   :  { %v769_v59 = vadd.f32 %v765_v2, %v94_v58 }
 0xbe9   :  { %1308 = vtanh.f32 %v769_v59  ;;  %v1206_v38 = vmul.f32 -1.442695, %v769_v59 }
 0xbee   :  { %v767_v60 = vpop.f32.mrf.mxu1 }
 0xbef   :  { %v1309_v61 = vpop.eup %1308 }
 0xbf0   :  { %792 = vrot.lane.b32.xlu0 %v1309_v61, %s1394_s30 }
 0xc02   :  { %v708_v62 = vpop.f32.mrf.mxu2 }
 0xc03   :  { %v709_v63 = vadd.f32 %v1529_v49, %v708_v62 }
 0xc05   :  { %1310 = vtanh.f32 %v709_v63  ;;  %v1204_v4 = vmul.f32 -1.442695, %v709_v63 }
 0xc06   :  { %1312 = vpow2.f32 %v1206_v38 }
 0xc07   :  { %1314 = vpow2.f32 %v1204_v4 }
 0xc0a   :  { %v710_v33 = vpop.f32.mrf.mxu2 }
 0xc0b   :  { %v1311_v37 = vpop.eup %1310 }
 0xc0c   :  { %734 = vrot.lane.b32.xlu2 %v1311_v37, %s1394_s30  ;;  %v1313_v7 = vpop.eup %1312 }
 0xc0d   :  { %v773_v1 = vadd.f32 1.0, %v1313_v7  ;;  %v1315_v39 = vpop.eup %1314 }
 0xc0e   :  { %v715_v3 = vadd.f32 1.0, %v1315_v39 }
 0xc0f   :  { %1316 = vrcp.f32 %v773_v1  ;;  %v785_v15 = vand.u32 2147483648, %v773_v1  ;;  %vm779_vm11 = vweird.f32 %v773_v1  ;;  %v783_v16 = vand.u32 2147483647, %v773_v1 }
 0xc10   :  { %1318 = vrcp.f32 %v715_v3  ;;  %v727_v20 = vand.u32 2147483648, %v715_v3  ;;  %vm721_vm15 = vweird.f32 %v715_v3  ;;  %v725_v21 = vand.u32 2147483647, %v715_v3 }
 0xc11   :  { %v786_v19 = vor.u32 1.1754944e-38, %v785_v15  ;;  %vm784_vm14 = vcmp.eq.f32.partialorder %v783_v16, 8.507059e+37 }
 0xc12   :  { %v728_v26 = vor.u32 1.1754944e-38, %v727_v20  ;;  %vm726_vm1 = vcmp.eq.f32.partialorder %v725_v21, 8.507059e+37 }
 0xc15   :  { %v1317_v5 = vpop.eup %1316 }
 0xc16   :  { %v775_v6 = vmul.f32 %v1317_v5, %v773_v1  ;;  %v1319_v8 = vpop.eup %1318  ;;  %vm780_vm10 = vweird.f32 %v1317_v5 }
 0xc17   :  { %v717_v10 = vmul.f32 %v1319_v8, %v715_v3  ;;  %vm781_vm12 = vmor %vm779_vm11, %vm780_vm10  ;;  %vm722_vm13 = vweird.f32 %v1319_v8 }
 0xc18   :  { %v776_v9 = vsub.f32 1.0, %v775_v6  ;;  %vm723_vm0 = vmor %vm721_vm15, %vm722_vm13 }
 0xc19   :  { %v718_v12 = vsub.f32 1.0, %v717_v10 }
 0xc1a   :  { %v777_v11 = vmul.f32 %v1317_v5, %v776_v9 }
 0xc1b   :  { %v719_v14 = vmul.f32 %v1319_v8, %v718_v12 }
 0xc1c   :  { %v778_v13 = vadd.f32 %v1317_v5, %v777_v11 }
 0xc1d   :  { %v720_v18 = vadd.f32 %v1319_v8, %v719_v14 }
 0xc1e   :  { %v782_v17 = vsel %vm781_vm12, %v1317_v5, %v778_v13 }
 0xc1f   :  { %v787_v23 = vsel %vm784_vm14, %v786_v19, %v782_v17  ;;  %v724_v25 = vsel %vm723_vm0, %v1319_v8, %v720_v18 }
 0xc20   :  { %v729_v29 = vsel %vm726_vm1, %v728_v26, %v724_v25  ;;  %v790_v32 = vmul.f32 %v787_v23, %v1630_v43 }
 0xc21   :  { %v732_v41 = vmul.f32 %v729_v29, %v1635_v34 }
 0xc62   :  { %v793_v22 = vpop.permute.xlu0 %792 }
 0xc63   :  { %v795_v24 = vmul.f32 %v793_v22, %v787_v23 }
 0xc65   :  { %797 = vrot.lane.b32.xlu2 %v795_v24, %s1394_s30 }
 0xc66   :  { %v735_v27 = vpop.permute.xlu2 %734 }
 0xc67   :  { %v737_v30 = vmul.f32 %v735_v27, %v729_v29 }
 0xc69   :  { %739 = vrot.lane.b32.xlu1 %v737_v30, %s1394_s30 }
 0xcbf   :  { %v798_v35 = vpop.permute.xlu2 %797 }
 0xcc0   :  { %v1656_v36 = vadd.f32 %v798_v35, %v790_v32 }
 0xcc2   :  { %1320 = vtanh.f32 %v1656_v36 }
 0xcc8   :  { %v1321_v31 = vpop.eup %1320 }
 0xcc9   :  { %803 = vrot.lane.b32.xlu1 %v1321_v31, %s1394_s30 }
 0xcdb   :  { %v740_v45 = vpop.permute.xlu1 %739 }
 0xcdc   :  { %v1661_v28 = vadd.f32 %v740_v45, %v732_v41 }
 0xcde   :  { %1322 = vtanh.f32 %v1661_v28 }
 0xce4   :  { %v1323_v46 = vpop.eup %1322 }
 0xce5   :  { %745 = vrot.lane.b32.xlu0 %v1323_v46, %s1394_s30 }
 0xd3b   :  { %v804_v48 = vpop.permute.xlu1 %803 }
 0xd3c   :  { %v806_v43 = vmul.f32 %v804_v48, %v787_v23 }
 0xd3e   :  { %v870_v42 = vpack.c.bf16 %v806_v43, %v806_v43  ;;  %808 = vrot.lane.b32.xlu2 %v806_v43, %s1395_s11 }
 0xd40   :  { %872 = vrot.lane.b32.xlu1 %v870_v42, %s1395_s11  ;;  %v33_v42 = vld [vmem:[%s1754_s0 + $0x38] sm:$0xff] }
 0xd46   :  { %67 = vperm.xlu2 %1231, %v32_v47  }
 0xd57   :  { %v746_v34 = vpop.permute.xlu0 %745 }
 0xd58   :  { %v748_v50 = vmul.f32 %v746_v34, %v729_v29 }
 0xd5a   :  { %812 = vrot.lane.b32.xlu0 %v748_v50, %s1396_s19 }
 0xd98   :  { %v809_v44 = vpop.permute.xlu2 %808 }
 0xda0   :  { %v68_v54 = vpop.permute.xlu2 %67 }
 0xda1   :  { %v84_v0 = vmul.f32 %v1677_v55, %v68_v54 }
 0xda3   :  { %v95_v57 = vadd.f32 %v1683_v56, %v84_v0 }
 0xdb2   :  { %v873_v40 = vpop.permute.xlu1 %872 }
 0xdb3   :  { %1209 = vmatmul.msk.bf16.vlgmr.msrb.gmra.mxu0 %vm123_vm4, %v873_v40 }
 0xdcc   :  { %v813_v51 = vpop.permute.xlu0 %812 }
 0xdcd   :  { %v815_v52 = vsel %vm123_vm4, %v809_v44, %v813_v51 }
 0xdce   :  { %v816_v53 = vpack.c.bf16 %v815_v52, %v815_v52 }
 0xdd0   :  { %1207 = vmatmul.msk.bf16.vlgmr.msra.gmra.mxu3 %vm211_vm5, %v816_v53 }
 0xe30   :  { %v886_v58 = vpop.f32.mrf.mxu0 }
 0xe31   :  { %v890_v2 = vadd.f32 %v886_v58, %v95_v57 }
 0xe33   :  { %1324 = vtanh.f32 %v890_v2  ;;  %v1210_v37 = vmul.f32 -1.442695, %v890_v2 }
 0xe38   :  { %v888_v59 = vpop.f32.mrf.mxu0 }
 0xe39   :  { %v1325_v60 = vpop.eup %1324 }
 0xe3a   :  { %913 = vrot.lane.b32.xlu1 %v1325_v60, %s1394_s30 }
 0xe53   :  { %v829_v61 = vpop.f32.mrf.mxu3 }
 0xe54   :  { %v830_v62 = vadd.f32 %v1529_v49, %v829_v61 }
 0xe56   :  { %1326 = vtanh.f32 %v830_v62  ;;  %v1208_v5 = vmul.f32 -1.442695, %v830_v62  ;;  %v1716_v62 = vld [vmem:[%s1758_s4 + $0x1] ss:$0 sm:$0xff] }
 0xe57   :  { %1328 = vpow2.f32 %v1210_v37 }
 0xe5b   :  { %v831_v63 = vpop.f32.mrf.mxu3 }
 0xe5c   :  { %v1327_v33 = vpop.eup %1326 }
 0xe5d   :  { %855 = vrot.lane.b32.xlu0 %v1327_v33, %s1394_s30  ;;  %v1329_v38 = vpop.eup %1328 }
 0xe5e   :  { %v894_v4 = vadd.f32 1.0, %v1329_v38 }
 0xe60   :  { %1330 = vrcp.f32 %v894_v4  ;;  %v906_v8 = vand.u32 2147483648, %v894_v4  ;;  %vm900_vm3 = vweird.f32 %v894_v4  ;;  %v904_v49 = vand.u32 2147483647, %v894_v4 }
 0xe61   :  { %1332 = vpow2.f32 %v1208_v5 }
 0xe62   :  { %v907_v10 = vor.u32 1.1754944e-38, %v906_v8  ;;  %vm905_vm7 = vcmp.eq.f32.partialorder %v904_v49, 8.507059e+37 }
 0xe66   :  { %v1331_v7 = vpop.eup %1330 }
 0xe67   :  { %v896_v1 = vmul.f32 %v1331_v7, %v894_v4  ;;  %vm901_vm2 = vweird.f32 %v1331_v7  ;;  %v1333_v11 = vpop.eup %1332 }
 0xe68   :  { %vm902_vm6 = vmor %vm900_vm3, %vm901_vm2  ;;  %v836_v15 = vadd.f32 1.0, %v1333_v11 }
 0xe69   :  { %v897_v39 = vsub.f32 1.0, %v896_v1 }
 0xe6a   :  { %1334 = vrcp.f32 %v836_v15  ;;  %v848_v21 = vand.u32 2147483648, %v836_v15  ;;  %vm842_vm9 = vweird.f32 %v836_v15  ;;  %v846_v22 = vand.u32 2147483647, %v836_v15 }
 0xe6b   :  { %v898_v3 = vmul.f32 %v1331_v7, %v897_v39 }
 0xe6c   :  { %v849_v24 = vor.u32 1.1754944e-38, %v848_v21  ;;  %vm847_vm11 = vcmp.eq.f32.partialorder %v846_v22, 8.507059e+37 }
 0xe6d   :  { %v899_v6 = vadd.f32 %v1331_v7, %v898_v3 }
 0xe6f   :  { %v903_v9 = vsel %vm902_vm6, %v1331_v7, %v899_v6 }
 0xe70   :  { %v908_v13 = vsel %vm905_vm7, %v907_v10, %v903_v9  ;;  %v1335_v16 = vpop.eup %1334 }
 0xe71   :  { %v838_v17 = vmul.f32 %v1335_v16, %v836_v15  ;;  %vm843_vm8 = vweird.f32 %v1335_v16  ;;  %v911_v29 = vmul.f32 %v908_v13, %v1656_v36 }
 0xe72   :  { %vm844_vm10 = vmor %vm842_vm9, %vm843_vm8  ;;  %vm1143_vm9 = vcmask 64512  }
 0xe73   :  { %v839_v18 = vsub.f32 1.0, %v838_v17 }
 0xe75   :  { %v840_v19 = vmul.f32 %v1335_v16, %v839_v18 }
 0xe77   :  { %v841_v20 = vadd.f32 %v1335_v16, %v840_v19 }
 0xe79   :  { %v845_v23 = vsel %vm844_vm10, %v1335_v16, %v841_v20 }
 0xe7a   :  { %v850_v26 = vsel %vm847_vm11, %v849_v24, %v845_v23 }
 0xe7b   :  { %v853_v31 = vmul.f32 %v850_v26, %v1661_v28 }
 0xeac   :  { %v914_v12 = vpop.permute.xlu1 %913 }
 0xead   :  { %v916_v14 = vmul.f32 %v914_v12, %v908_v13 }
 0xeaf   :  { %918 = vrot.lane.b32.xlu0 %v916_v14, %s1394_s30 }
 0xecf   :  { %v856_v25 = vpop.permute.xlu0 %855 }
 0xed0   :  { %v858_v27 = vmul.f32 %v856_v25, %v850_v26 }
 0xed2   :  { %860 = vrot.lane.b32.xlu2 %v858_v27, %s1394_s30 }
 0xf21   :  { %v919_v30 = vpop.permute.xlu0 %918 }
 0xf22   :  { %v1692_v32 = vadd.f32 %v919_v30, %v911_v29 }
 0xf24   :  { %1336 = vtanh.f32 %v1692_v32 }
 0xf2a   :  { %v1337_v35 = vpop.eup %1336 }
 0xf2b   :  { %924 = vrot.lane.b32.xlu2 %v1337_v35, %s1394_s30 }
 0xf2c   :  { %v861_v41 = vpop.permute.xlu2 %860 }
 0xf2d   :  { %v1697_v45 = vadd.f32 %v861_v41, %v853_v31 }
 0xf2f   :  { %1338 = vtanh.f32 %v1697_v45 }
 0xf35   :  { %v1339_v46 = vpop.eup %1338 }
 0xf36   :  { %866 = vrot.lane.b32.xlu1 %v1339_v46, %s1394_s30 }
 0xf85   :  { %v925_v48 = vpop.permute.xlu2 %924 }
 0xf86   :  { %v927_v36 = vmul.f32 %v925_v48, %v908_v13 }
 0xf88   :  { %v991_v43 = vpack.c.bf16 %v927_v36, %v927_v36  ;;  %929 = vrot.lane.b32.xlu0 %v927_v36, %s1395_s11 }
 0xf8a   :  { %993 = vrot.lane.b32.xlu2 %v991_v43, %s1395_s11 }
 0xf90   :  { %72 = vperm.xlu0 %1229, %v33_v42  }
 0xfa8   :  { %v867_v28 = vpop.permute.xlu1 %866 }
 0xfa9   :  { %v869_v47 = vmul.f32 %v867_v28, %v850_v26 }
 0xfab   :  { %933 = vrot.lane.b32.xlu1 %v869_v47, %s1396_s19 }
 0xfe4   :  { %v994_v34 = vpop.permute.xlu2 %993 }
 0xfe5   :  { %1213 = vmatmul.msk.bf16.vlgmr.msrb.gmra.mxu1 %vm123_vm4, %v994_v34 }
 0xffa   :  { %v930_v50 = vpop.permute.xlu0 %929 }
0x1002   :  { %v73_v52 = vpop.permute.xlu0 %72 }
0x1003   :  { %v85_v53 = vmul.f32 %v1677_v55, %v73_v52 }
0x1005   :  { %v96_v54 = vadd.f32 %v1683_v56, %v85_v53 }
0x101d   :  { %v934_v40 = vpop.permute.xlu1 %933 }
0x101e   :  { %v936_v44 = vsel %vm123_vm4, %v930_v50, %v934_v40 }
0x101f   :  { %v937_v51 = vpack.c.bf16 %v936_v44, %v936_v44 }
0x1021   :  { %1211 = vmatmul.msk.bf16.vlgmr.msrb.gmra.mxu2 %vm211_vm5, %v937_v51 }
0x1062   :  { %v1007_v0 = vpop.f32.mrf.mxu1 }
0x1063   :  { %v1011_v57 = vadd.f32 %v1007_v0, %v96_v54 }
0x1065   :  { %1340 = vtanh.f32 %v1011_v57  ;;  %v1214_v59 = vmul.f32 -1.442695, %v1011_v57 }
0x1067   :  { %1342 = vpow2.f32 %v1214_v59 }
0x106a   :  { %v1009_v58 = vpop.f32.mrf.mxu1 }
0x106b   :  { %v1341_v2 = vpop.eup %1340 }
0x106c   :  { %1034 = vrot.lane.b32.xlu2 %v1341_v2, %s1394_s30 }
0x106d   :  { %v1343_v60 = vpop.eup %1342 }
0x106e   :  { %v1015_v63 = vadd.f32 1.0, %v1343_v60 }
0x1070   :  { %v1027_v39 = vand.u32 2147483648, %v1015_v63  ;;  %vm1021_vm13 = vweird.f32 %v1015_v63  ;;  %v1025_v3 = vand.u32 2147483647, %v1015_v63 }
0x1072   :  { %v1028_v6 = vor.u32 1.1754944e-38, %v1027_v39  ;;  %vm1026_vm15 = vcmp.eq.f32.partialorder %v1025_v3, 8.507059e+37  ;;  %v1112_v39 = vld [vmem:[%s1759_s5] sm:$0xff] }
0x10a4   :  { %v950_v61 = vpop.f32.mrf.mxu2 }
0x10a5   :  { %v951_v55 = vadd.f32 %v1716_v62, %v950_v61 }
0x10a7   :  { %1344 = vtanh.f32 %v951_v55  ;;  %v1212_v10 = vmul.f32 -1.442695, %v951_v55 }
0x10a8   :  { %1346 = vrcp.f32 %v1015_v63 }
0x10a9   :  { %1348 = vpow2.f32 %v1212_v10 }
0x10ac   :  { %v952_v56 = vpop.f32.mrf.mxu2 }
0x10ad   :  { %v1345_v33 = vpop.eup %1344 }
0x10ae   :  { %976 = vrot.lane.b32.xlu1 %v1345_v33, %s1394_s30  ;;  %v1347_v37 = vpop.eup %1346 }
0x10af   :  { %v1017_v38 = vmul.f32 %v1347_v37, %v1015_v63  ;;  %vm1022_vm12 = vweird.f32 %v1347_v37  ;;  %v1349_v11 = vpop.eup %1348 }
0x10b0   :  { %vm1023_vm14 = vmor %vm1021_vm13, %vm1022_vm12  ;;  %v957_v12 = vadd.f32 1.0, %v1349_v11 }
0x10b1   :  { %v1018_v4 = vsub.f32 1.0, %v1017_v38 }
0x10b2   :  { %1350 = vrcp.f32 %v957_v12  ;;  %v969_v18 = vand.u32 2147483648, %v957_v12  ;;  %vm963_vm1 = vweird.f32 %v957_v12  ;;  %v967_v19 = vand.u32 2147483647, %v957_v12 }
0x10b3   :  { %v1019_v7 = vmul.f32 %v1347_v37, %v1018_v4  ;;  %v1115_v4 = vld [vmem:[%s1759_s5 + $0x18] sm:$0xff] }
0x10b4   :  { %v970_v21 = vor.u32 1.1754944e-38, %v969_v18  ;;  %vm968_vm3 = vcmp.eq.f32.partialorder %v967_v19, 8.507059e+37  ;;  %1135 = vmatpush.msra.mxu0 %v1115_v4 }
0x10b5   :  { %v1020_v1 = vadd.f32 %v1347_v37, %v1019_v7  ;;  %v1114_v7 = vld [vmem:[%s1759_s5 + $0x10] sm:$0xff] }
0x10b6   :  { %1136 = vmatpush.msra.mxu0 %v1114_v7 }
0x10b7   :  { %v1024_v5 = vsel %vm1023_vm14, %v1347_v37, %v1020_v1  ;;  %v1113_v1 = vld [vmem:[%s1759_s5 + $0x8] sm:$0xff] }
0x10b8   :  { %v1029_v49 = vsel %vm1026_vm15, %v1028_v6, %v1024_v5  ;;  %v1351_v13 = vpop.eup %1350  ;;  %1137 = vmatpush.msra.mxu0 %v1113_v1 }
0x10b9   :  { %v959_v14 = vmul.f32 %v1351_v13, %v957_v12  ;;  %vm964_vm0 = vweird.f32 %v1351_v13  ;;  %v1032_v25 = vmul.f32 %v1029_v49, %v1692_v32 }
0x10ba   :  { %vm965_vm2 = vmor %vm963_vm1, %vm964_vm0  ;;  %1138 = vmatpush.msra.mxu0 %v1112_v39 }
0x10bb   :  { %v960_v15 = vsub.f32 1.0, %v959_v14 }
0x10bd   :  { %v961_v16 = vmul.f32 %v1351_v13, %v960_v15 }
0x10bf   :  { %v962_v17 = vadd.f32 %v1351_v13, %v961_v16 }
0x10c1   :  { %v966_v20 = vsel %vm965_vm2, %v1351_v13, %v962_v17 }
0x10c2   :  { %v971_v23 = vsel %vm968_vm3, %v970_v21, %v966_v20 }
0x10c3   :  { %v974_v30 = vmul.f32 %v971_v23, %v1697_v45 }
0x10c6   :  { %v1035_v8 = vpop.permute.xlu2 %1034 }
0x10c7   :  { %v1037_v9 = vmul.f32 %v1035_v8, %v1029_v49  ;;  %v1235_v8 = vld [vmem:[%s1759_s5 + $0x20] ss:$0 sm:$0xff] }
0x10c9   :  { %1039 = vrot.lane.b32.xlu1 %v1037_v9, %s1394_s30 }
0x1120   :  { %v977_v22 = vpop.permute.xlu1 %976 }
0x1121   :  { %v979_v24 = vmul.f32 %v977_v22, %v971_v23 }
0x1123   :  { %981 = vrot.lane.b32.xlu0 %v979_v24, %s1394_s30 }
0x113b   :  { %v1040_v26 = vpop.permute.xlu1 %1039 }
0x113c   :  { %v1042_v27 = vadd.f32 %v1040_v26, %v1032_v25 }
0x113e   :  { %1352 = vtanh.f32 %v1042_v27 }
0x1144   :  { %v1353_v29 = vpop.eup %1352 }
0x1145   :  { %1045 = vrot.lane.b32.xlu0 %v1353_v29, %s1394_s30 }
0x1195   :  { %v982_v35 = vpop.permute.xlu0 %981 }
0x1196   :  { %v984_v31 = vadd.f32 %v982_v35, %v974_v30 }
0x1198   :  { %1354 = vtanh.f32 %v984_v31 }
0x119e   :  { %v1355_v41 = vpop.eup %1354 }
0x119f   :  { %987 = vrot.lane.b32.xlu2 %v1355_v41, %s1394_s30 }
0x11b7   :  { %v1046_v46 = vpop.permute.xlu0 %1045 }
0x11b8   :  { %v1048_v48 = vmul.f32 %v1046_v46, %v1029_v49 }
0x11ba   :  { %1050 = vrot.lane.b32.xlu1 %v1048_v48, %s1395_s11 }
0x11f9   :  { %v988_v36 = vpop.permute.xlu2 %987 }
0x11fa   :  { %v990_v32 = vmul.f32 %v988_v36, %v971_v23 }
0x11fc   :  { %1054 = vrot.lane.b32.xlu2 %v990_v32, %s1396_s19 }
0x122c   :  { %v1051_v43 = vpop.permute.xlu1 %1050 }
0x1256   :  { %v1055_v42 = vpop.permute.xlu2 %1054 }
0x1257   :  { %v1057_v28 = vsel %vm123_vm4, %v1051_v43, %v1055_v42 }
0x1258   :  { %v1058_v47 = vpack.c.bf16 %v1057_v28, %v1057_v28 }
0x125a   :  { %1215 = vmatmul.msk.bf16.vlgmr.msrb.gmra.mxu3 %vm211_vm5, %v1058_v47 }
0x12dd   :  { %v1071_v45 = vpop.f32.mrf.mxu3 }
0x12de   :  { %v1072_v34 = vadd.f32 %v1716_v62, %v1071_v45 }
0x12e0   :  { %1356 = vtanh.f32 %v1072_v34  ;;  %v1216_v44 = vmul.f32 -1.442695, %v1072_v34 }
0x12e2   :  { %1358 = vpow2.f32 %v1216_v44 }
0x12e5   :  { %v1073_v50 = vpop.f32.mrf.mxu3 }
0x12e6   :  { %v1357_v40 = vpop.eup %1356 }
0x12e7   :  { %1097 = vrot.lane.b32.xlu0 %v1357_v40, %s1394_s30 }
0x12e8   :  { %v1359_v51 = vpop.eup %1358 }
0x12e9   :  { %v1078_v52 = vadd.f32 1.0, %v1359_v51 }
0x12eb   :  { %1360 = vrcp.f32 %v1078_v52  ;;  %v1090_v2 = vand.u32 2147483648, %v1078_v52  ;;  %vm1084_vm5 = vweird.f32 %v1078_v52  ;;  %v1088_v59 = vand.u32 2147483647, %v1078_v52 }
0x12ed   :  { %v1091_v61 = vor.u32 1.1754944e-38, %v1090_v2  ;;  %vm1089_vm8 = vcmp.eq.f32.partialorder %v1088_v59, 8.507059e+37 }
0x12f1   :  { %v1361_v53 = vpop.eup %1360 }
0x12f2   :  { %v1080_v54 = vmul.f32 %v1361_v53, %v1078_v52  ;;  %vm1085_vm6 = vweird.f32 %v1361_v53 }
0x12f3   :  { %vm1086_vm7 = vmor %vm1084_vm5, %vm1085_vm6 }
0x12f4   :  { %v1081_v0 = vsub.f32 1.0, %v1080_v54 }
0x12f6   :  { %v1082_v57 = vmul.f32 %v1361_v53, %v1081_v0 }
0x12f8   :  { %v1083_v58 = vadd.f32 %v1361_v53, %v1082_v57 }
0x12fa   :  { %v1087_v60 = vsel %vm1086_vm7, %v1361_v53, %v1083_v58 }
0x12fb   :  { %v1092_v55 = vsel %vm1089_vm8, %v1091_v61, %v1087_v60 }
0x12fc   :  { %v1095_v56 = vmul.f32 %v1092_v55, %v984_v31 }
0x1359   :  { %v1098_v62 = vpop.permute.xlu0 %1097 }
0x135a   :  { %v1100_v63 = vmul.f32 %v1098_v62, %v1092_v55 }
0x135c   :  { %1102 = vrot.lane.b32.xlu1 %v1100_v63, %s1394_s30 }
0x13ce   :  { %v1103_v33 = vpop.permute.xlu1 %1102 }
0x13cf   :  { %v1105_v37 = vadd.f32 %v1103_v33, %v1095_v56 }
0x13d1   :  { %1362 = vtanh.f32 %v1105_v37 }
0x13d7   :  { %v1363_v38 = vpop.eup %1362 }
0x13d8   :  { %1108 = vrot.lane.b32.xlu2 %v1363_v38, %s1394_s30 }
0x1432   :  { %v1109_v3 = vpop.permute.xlu2 %1108 }
0x1433   :  { %v1111_v5 = vmul.f32 %v1109_v3, %v1092_v55 }
0x1435   :  { %1119 = vrot.lane.b32.xlu0 %v1111_v5, %s1395_s11 }
0x14a7   :  { %v1120_v6 = vpop.permute.xlu0 %1119 }
0x14a8   :  { %1217 = vmatmul.msk.f32.vlgmr.msra.gmra.mxu0 %vm123_vm4, %v1120_v6 }
0x1525   :  { %v1140_v49 = vpop.f32.mrf.mxu0 }
0x1526   :  { %v1141_v9 = vadd.f32 %v1235_v8, %v1140_v49 }
0x1528   :  { %1144 = vst.msk [vmem:[#allocation2] sm:$0xff] %vm1143_vm9, %v1141_v9 }
0x1529   :  { %1155 = dma.vmem_to_hbm [thread:$0]  %s1151_s21, 128, %s1153_s24, [#allocation3]  }
0x152a   :  { %1391 = dma.done.wait [#allocation3], 128  }
0x152b   :  { %1392 = vsyncadd [#allocation3], 4294967168 }
0x152c   :  { %1160 = vsyncpa [#allocation3], 1 }

</bundles_post_ra>
